<compile_context>
chip_gen: v7x
topology: tpu7x:2x2x1
jax: 0.10.0
libtpu: 0.0.40
codegen_flags: <defaults>
</compile_context>

<pallas_src>
import functools

import jax
import jax.numpy as jnp
from jax.experimental import pallas as pl
from jax.experimental.pallas import tpu as pltpu


def _round_up(v, m):
    return (v + m - 1) // m * m


def _vmem_capacity_bytes():
    try:
        cap = getattr(pltpu.get_tpu_info(), "vmem_capacity_bytes", None)
        if cap:
            return int(cap)
    except Exception:
        pass
    return 64 << 20  # conservative: smallest per-core VMEM across v5e/v6e/v7x


def _exp_dtype_for_device():
    # bf16 exp roughly doubles EUP throughput on v6e/v7x and halves the N x N
    # buffer; older generations have no bf16 EUP path, so keep f32 there (and
    # whenever the probe fails).
    try:
        kind = jax.devices()[0].device_kind.lower()
    except Exception:
        return jnp.float32
    for old in ("v2", "v3", "v4", "v5"):
        if old in kind:
            return jnp.float32
    return jnp.bfloat16


def _transformer_block_kernel(
    x_ref,      # (Bt, N, Cp) f32   pre (channels-last features, zero-padded lanes)
    pos_ref,    # (Bt, N, Cp) f32   positional encoding (precomputed, zero-padded)
    w_ref,      # (Cp, 3*Cp) bf16   [Wqk^T | Wv^T | Wt^T], zero-padded
    vec_ref,    # (3, Cp)    f32    [v_bias, bn_scale, bn_shift'] (trans bias folded)
    out_ref,    # (Bt, N, Cp) f32
    *,
    n: int,
    c_real: int,
    c_pad: int,
    bt: int,
    exp_dtype,
):
    f32 = jnp.float32
    bf16 = jnp.bfloat16
    cp = c_pad

    vecs = vec_ref[...]
    bv = vecs[0:1, :]
    bns = vecs[1:2, :]
    bnb = vecs[2:3, :]

    # Fused q/k + v projection over the whole (Bt*N, Cp) block: one bf16 MXU
    # matmul with a lane-dense 2*Cp-wide output, f32 accumulation.  q and k share
    # the same bias-free 1x1-conv weight -> identical activations.
    h_bf = (x_ref[...] + pos_ref[...]).reshape(bt * n, cp).astype(bf16)
    qv = jnp.dot(h_bf, w_ref[:, : 2 * cp], preferred_element_type=f32)
    q_bf = qv[:, :cp].astype(bf16)           # (Bt*N, Cp)
    v = qv[:, cp:] + bv                      # (Bt*N, Cp) f32, padded lanes stay 0

    # Lane mask selecting the spare padded column that carries the attention
    # column-sum through the f @ v_aug matmul.
    col_ids = jax.lax.broadcasted_iota(jnp.int32, (1, cp), 1)
    aug_mask = col_ids == c_real             # (1, Cp) bool

    for b in range(bt):                      # static, small: amortizes grid-step cost
        r0 = b * n
        q_b = q_bf[r0:r0 + n, :]             # (N, Cp) bf16

        # energy[i, j] = <q_i, q_j>  (symmetric); bf16 inputs, f32 accumulation.
        energy = jax.lax.dot_general(
            q_b, q_b, (((1,), (1,)), ((), ())), preferred_element_type=f32)

        # Row-softmax evaluated in transposed form: by symmetry (q == k, single
        # dot_general) the axis-0 max / sum over column i equal the row max /
        # softmax denominator of query row i, so no N x N transpose is needed.
        colmax = jnp.max(energy, axis=0, keepdims=True)             # (1, N)
        f = jnp.exp((energy - colmax).astype(exp_dtype))            # f[j, i] = e_ij
        z = jnp.sum(f, axis=0, keepdims=True, dtype=f32)            # (1, N)
        rz = pl.reciprocal(z, approx=True).reshape(n, 1)            # (N, 1)

        # Fold the row-softmax denominator into v; the second (column-sum)
        # normalizer rides in the spare padded lane, so one matmul yields both
        # the numerator and the per-column attention sums.
        v_b = v[r0:r0 + n, :]                                       # (N, Cp)
        v_aug = jnp.where(aug_mask, rz, v_b * rz).astype(bf16)      # (N, Cp)
        x_r_aug = jnp.dot(f.astype(bf16), v_aug,
                          preferred_element_type=f32)               # (N, Cp)

        colsum = jnp.sum(jnp.where(aug_mask, x_r_aug, 0.0),
                         axis=1, keepdims=True)                     # (N, 1)
        x_r = x_r_aug * pl.reciprocal(1e-9 + colsum, approx=True)

        # trans_conv -> eval-mode BatchNorm (conv bias folded into shift) ->
        # ReLU -> residual.  h is recomputed here (cheap VPU add) so its live
        # range does not span the N^2 region; padded lanes of x_r are harmless
        # because the padded rows/cols of Wt are zero, and they are sliced off
        # in the wrapper anyway.
        h_b = x_ref[b] + pos_ref[b]                                 # (N, Cp) f32
        d = (h_b - x_r).astype(bf16)
        t = jnp.dot(d, w_ref[:, 2 * cp:], preferred_element_type=f32)
        out_ref[b] = x_ref[b] + jnp.maximum(t * bns + bnb, 0.0)


def transformer_block(xyz, x, params):
    """xyz: (B, N, 3), x: (B, N, C) channels-last features -> (B, N, C)."""
    B, N, C = x.shape
    eps = 1e-5
    f32 = jnp.float32
    bf16 = jnp.bfloat16

    # Pad channels to a 128 multiple (with one spare lane reserved for the
    # attention column-sum) so stores are lane-dense and the MXU runs full width.
    Cp = _round_up(C + 1, 128)

    # Positional encoding (mean-centering + K=3 GEMM + CxC GEMM) stays in XLA:
    # a K=3 contraction runs the MXU at <3% utilization and would force an
    # awkward lane-3 DMA.  fc2 is padded so pos lands directly at Cp lanes with
    # the padded channels identically zero.
    delta = xyz - jnp.mean(xyz, axis=1, keepdims=True)
    h1 = jnp.maximum(delta @ params["fc1_w"].T + params["fc1_b"], 0.0)
    fc2_wT = jnp.pad(params["fc2_w"].T, ((0, 0), (0, Cp - C)))
    fc2_b = jnp.pad(params["fc2_b"], (0, Cp - C))
    pos = (h1 @ fc2_wT + fc2_b).astype(f32)                         # (B, N, Cp)

    x_p = jnp.pad(x.astype(f32), ((0, 0), (0, 0), (0, Cp - C)))     # (B, N, Cp)

    # Pack / pre-transpose / zero-pad / pre-cast the three CxC 1x1-conv weights
    # into one (Cp, 3*Cp) bf16 slab: [Wqk^T | Wv^T | Wt^T].
    def pad_wT(w):
        return jnp.pad(w.T, ((0, Cp - C), (0, Cp - C)))

    w_qkvt = jnp.concatenate(
        [pad_wT(params["qk_w"]), pad_wT(params["v_w"]), pad_wT(params["t_w"])],
        axis=1).astype(bf16)                                        # (Cp, 3*Cp)

    # Eval-mode BatchNorm folded to scale/shift; trans-conv bias folded into the
    # shift (bn_shift' = t_b * scale + shift).
    bn_scale = params["bn_gamma"] / jnp.sqrt(params["bn_var"] + eps)
    bn_shift = params["bn_beta"] - params["bn_mean"] * bn_scale
    bn_shift = params["t_b"] * bn_scale + bn_shift
    vec_packed = jnp.stack([
        jnp.pad(params["v_b"], (0, Cp - C)),
        jnp.pad(bn_scale, (0, Cp - C)),
        jnp.pad(bn_shift, (0, Cp - C)),
    ]).astype(f32)                                                  # (3, Cp)

    # Batch elements per grid step: amortize the ~0.35 us/step overhead at small
    # N while keeping >= 2 grid steps so the parallel axis can still shard
    # across v7x's two TensorCores.
    Bt = 1
    for cand in range(2, B + 1):
        if B % cand == 0 and cand * N <= 512 and B // cand >= 2:
            Bt = cand

    exp_dtype = _exp_dtype_for_device()

    grid_spec = pltpu.PrefetchScalarGridSpec(
        num_scalar_prefetch=0,
        grid=(B // Bt,),
        in_specs=[
            pl.BlockSpec((Bt, N, Cp), lambda b: (b, 0, 0)),   # x (pre), padded
            pl.BlockSpec((Bt, N, Cp), lambda b: (b, 0, 0)),   # pos, padded
            pl.BlockSpec((Cp, 3 * Cp), lambda b: (0, 0)),     # packed weights (bf16)
            pl.BlockSpec((3, Cp), lambda b: (0, 0)),          # v bias / BN scale+shift
        ],
        out_specs=pl.BlockSpec((Bt, N, Cp), lambda b: (b, 0, 0)),
    )

    # Scoped-VMEM sizing: the N x N attention intermediates dominate.  Always
    # set the limit explicitly (v5e's default is only 16 MiB) and clamp below
    # the probed per-core VMEM capacity, leaving headroom for Mosaic scratch.
    exp_bytes = 2 if exp_dtype == bf16 else 4
    attn_bytes = (4 + 4 + exp_bytes) * N * N            # energy + diff + f
    blk_bytes = (3 * 2 + 12) * Bt * N * Cp * 4          # double-buffered I/O + temps
    w_bytes = 2 * (Cp * 3 * Cp * 2 + 3 * Cp * 4)
    vmem_needed = attn_bytes + blk_bytes + w_bytes + (4 << 20)
    vmem_cap = _vmem_capacity_bytes() - (12 << 20)
    vmem_limit = int(min(max(vmem_needed, 32 << 20), vmem_cap))

    kernel = functools.partial(
        _transformer_block_kernel,
        n=N, c_real=C, c_pad=Cp, bt=Bt, exp_dtype=exp_dtype)

    out = pl.pallas_call(
        kernel,
        out_shape=jax.ShapeDtypeStruct((B, N, Cp), f32),
        grid_spec=grid_spec,
        compiler_params=pltpu.CompilerParams(
            dimension_semantics=("parallel",),
            vmem_limit_bytes=vmem_limit),
    )(x_p, pos, w_qkvt, vec_packed)
    return out[:, :, :C]


def _ref_forward(xyz, x, params):
    """Pure-JAX f32 reference of the PyTorch forward (eval-mode BN), channels-last."""
    eps = 1e-5
    delta = xyz - jnp.mean(xyz, axis=1, keepdims=True)
    h1 = jnp.maximum(delta @ params["fc1_w"].T + params["fc1_b"], 0.0)
    pos = h1 @ params["fc2_w"].T + params["fc2_b"]
    h = x + pos
    q = h @ params["qk_w"].T
    v = h @ params["v_w"].T + params["v_b"]
    energy = jnp.einsum("bnc,bmc->bnm", q, q)
    att = jax.nn.softmax(energy, axis=-1)
    att = att / (1e-9 + jnp.sum(att, axis=1, keepdims=True))
    x_r = jnp.einsum("bnm,bnc->bmc", att, v)
    t = (h - x_r) @ params["t_w"].T + params["t_b"]
    scale = params["bn_gamma"] / jnp.sqrt(params["bn_var"] + eps)
    shift = params["bn_beta"] - params["bn_mean"] * scale
    r = jnp.maximum(t * scale + shift, 0.0)
    return x + r


def _init_params(key, C):
    ks = jax.random.split(key, 10)
    return {
        "fc1_w": 0.1 * jax.random.normal(ks[0], (C, 3), jnp.float32),
        "fc1_b": 0.1 * jax.random.normal(ks[1], (C,), jnp.float32),
        "fc2_w": 0.1 * jax.random.normal(ks[2], (C, C), jnp.float32),
        "fc2_b": 0.1 * jax.random.normal(ks[3], (C,), jnp.float32),
        "qk_w": 0.1 * jax.random.normal(ks[4], (C, C), jnp.float32),
        "v_w": 0.1 * jax.random.normal(ks[5], (C, C), jnp.float32),
        "v_b": 0.1 * jax.random.normal(ks[6], (C,), jnp.float32),
        "t_w": 0.1 * jax.random.normal(ks[7], (C, C), jnp.float32),
        "t_b": 0.1 * jax.random.normal(ks[8], (C,), jnp.float32),
        "bn_gamma": 1.0 + 0.05 * jax.random.normal(ks[9], (C,), jnp.float32),
        "bn_beta": 0.02 * jnp.arange(C, dtype=jnp.float32),
        "bn_mean": 0.01 * jnp.arange(C, dtype=jnp.float32),
        "bn_var": 1.0 + 0.01 * jnp.arange(C, dtype=jnp.float32),
    }


if __name__ == "__main__":
    # B=4 exercises the multi-batch-per-grid-step path (Bt=2, 2 grid steps).
    B, N, C = 4, 64, 32          # batch, points, d_points channels
    key = jax.random.PRNGKey(0)
    k_xyz, k_x, k_p = jax.random.split(key, 3)

    xyz = jax.random.normal(k_xyz, (B, N, 3), jnp.float32)
    x = jax.random.normal(k_x, (B, N, C), jnp.float32)
    params = _init_params(k_p, C)

    out = jax.block_until_ready(transformer_block(xyz, x, params))
    ref = jax.block_until_ready(_ref_forward(xyz, x, params))

    assert out.shape == (B, N, C)
    # bf16 matmul inputs (+ bf16 exp on v6e/v7x) + approx reciprocals -> looser
    # tolerance than pure f32.
    assert jnp.allclose(out, ref, atol=5e-2, rtol=5e-2), float(
        jnp.max(jnp.abs(out - ref)))
    print("KERNEL_OK")
</pallas_src>

<mosaic_0001>
module attributes {stable_mosaic.version = 11 : i64} {
  func.func @_transformer_block_kernel(%arg0: i32, %arg1: memref<2x64x128xf32, #tpu.memory_space<vmem>>, %arg2: memref<2x64x128xf32, #tpu.memory_space<vmem>>, %arg3: memref<128x384xbf16, #tpu.memory_space<vmem>>, %arg4: memref<3x128xf32, #tpu.memory_space<vmem>>, %arg5: memref<2x64x128xf32, #tpu.memory_space<vmem>>) attributes {dimension_semantics = [#tpu.dimension_semantics<parallel>], iteration_bounds = array<i64: 2>, scalar_prefetch = 0 : i64, scratch_operands = 0 : i64, tpu.core_type = #tpu.core_type<tc>, window_params = [{transform_indices = @transform_0, window_bounds = array<i64: 2, 64, 128>}, {transform_indices = @transform_1, window_bounds = array<i64: 2, 64, 128>}, {pipeline_mode = #tpu.pipeline_mode<synchronous>, transform_indices = @transform_2, window_bounds = array<i64: 128, 384>}, {pipeline_mode = #tpu.pipeline_mode<synchronous>, transform_indices = @transform_3, window_bounds = array<i64: 3, 128>}, {transform_indices = @transform_4, window_bounds = array<i64: 2, 64, 128>}]} {
    %c0 = arith.constant 0 : index
    %c0_0 = arith.constant 0 : index
    %0 = vector.load %arg4[%c0, %c0_0] : memref<3x128xf32, #tpu.memory_space<vmem>>, vector<3x128xf32>
    %1 = vector.extract_strided_slice %0 {offsets = [0, 0], sizes = [1, 128], strides = [1, 1]} : vector<3x128xf32> to vector<1x128xf32>
    %2 = vector.extract_strided_slice %0 {offsets = [1, 0], sizes = [1, 128], strides = [1, 1]} : vector<3x128xf32> to vector<1x128xf32>
    %3 = vector.extract_strided_slice %0 {offsets = [2, 0], sizes = [1, 128], strides = [1, 1]} : vector<3x128xf32> to vector<1x128xf32>
    %c0_1 = arith.constant 0 : index
    %c0_2 = arith.constant 0 : index
    %c0_3 = arith.constant 0 : index
    %4 = vector.load %arg1[%c0_1, %c0_2, %c0_3] : memref<2x64x128xf32, #tpu.memory_space<vmem>>, vector<2x64x128xf32>
    %c0_4 = arith.constant 0 : index
    %c0_5 = arith.constant 0 : index
    %c0_6 = arith.constant 0 : index
    %5 = vector.load %arg2[%c0_4, %c0_5, %c0_6] : memref<2x64x128xf32, #tpu.memory_space<vmem>>, vector<2x64x128xf32>
    %6 = arith.addf %4, %5 : vector<2x64x128xf32>
    %7 = vector.shape_cast %6 : vector<2x64x128xf32> to vector<128x128xf32>
    %8 = arith.truncf %7 : vector<128x128xf32> to vector<128x128xbf16>
    %c0_7 = arith.constant 0 : index
    %c0_8 = arith.constant 0 : index
    %9 = vector.load %arg3[%c0_7, %c0_8] : memref<128x384xbf16, #tpu.memory_space<vmem>>, vector<128x256xbf16>
    %cst = arith.constant dense<0.000000e+00> : vector<128x256xf32>
    %10 = tpu.matmul %8, %9, %cst {dimension_numbers = #tpu.dot_dimension_numbers<[1], [0], [0], [1], [0, 0, 1, 1], [], []>} : vector<128x128xbf16>, vector<128x256xbf16>, vector<128x256xf32> -> vector<128x256xf32>
    %11 = vector.extract_strided_slice %10 {offsets = [0, 0], sizes = [128, 128], strides = [1, 1]} : vector<128x256xf32> to vector<128x128xf32>
    %12 = arith.truncf %11 : vector<128x128xf32> to vector<128x128xbf16>
    %13 = vector.extract_strided_slice %10 {offsets = [0, 128], sizes = [128, 128], strides = [1, 1]} : vector<128x256xf32> to vector<128x128xf32>
    %14 = vector.broadcast %1 : vector<1x128xf32> to vector<128x128xf32>
    %15 = arith.addf %13, %14 : vector<128x128xf32>
    %16 = tpu.iota {dimensions = array<i32: 1>} : vector<1x128xi32>
    %c32_i32 = arith.constant 32 : i32
    %17 = vector.broadcast %c32_i32 : i32 to vector<1x128xi32>
    %18 = arith.cmpi eq, %16, %17 : vector<1x128xi32>
    %19 = vector.extract_strided_slice %12 {offsets = [0, 0], sizes = [64, 128], strides = [1, 1]} : vector<128x128xbf16> to vector<64x128xbf16>
    %cst_9 = arith.constant dense<0.000000e+00> : vector<64x64xf32>
    %20 = tpu.matmul %19, %19, %cst_9 {dimension_numbers = #tpu.dot_dimension_numbers<[1], [1], [0], [0], [0, 0, 1, 0], [], []>} : vector<64x128xbf16>, vector<64x128xbf16>, vector<64x64xf32> -> vector<64x64xf32>
    %cst_10 = arith.constant dense<0xFF800000> : vector<64xf32>
    %21 = vector.multi_reduction <maximumf>, %20, %cst_10 [0] : vector<64x64xf32> to vector<64xf32>
    %22 = vector.shape_cast %21 : vector<64xf32> to vector<1x64xf32>
    %23 = vector.broadcast %22 : vector<1x64xf32> to vector<64x64xf32>
    %24 = arith.subf %20, %23 : vector<64x64xf32>
    %25 = arith.truncf %24 : vector<64x64xf32> to vector<64x64xbf16>
    %26 = math.exp %25 : vector<64x64xbf16>
    %27 = arith.extf %26 : vector<64x64xbf16> to vector<64x64xf32>
    %cst_11 = arith.constant dense<0.000000e+00> : vector<64xf32>
    %28 = vector.multi_reduction <add>, %27, %cst_11 [0] : vector<64x64xf32> to vector<64xf32>
    %29 = vector.shape_cast %28 : vector<64xf32> to vector<1x64xf32>
    %30 = tpu.reciprocal %29 {approx = true} : vector<1x64xf32> -> vector<1x64xf32>
    %31 = vector.shape_cast %30 : vector<1x64xf32> to vector<64x1xf32>
    %32 = vector.extract_strided_slice %15 {offsets = [0, 0], sizes = [64, 128], strides = [1, 1]} : vector<128x128xf32> to vector<64x128xf32>
    %33 = vector.broadcast %31 : vector<64x1xf32> to vector<64x128xf32>
    %34 = arith.mulf %32, %33 : vector<64x128xf32>
    %35 = vector.shape_cast %18 : vector<1x128xi1> to vector<1x128xi1>
    %36 = vector.broadcast %35 : vector<1x128xi1> to vector<64x128xi1>
    %37 = vector.shape_cast %31 : vector<64x1xf32> to vector<64x1xf32>
    %38 = vector.broadcast %37 : vector<64x1xf32> to vector<64x128xf32>
    %39 = arith.select %36, %38, %34 : vector<64x128xi1>, vector<64x128xf32>
    %40 = arith.truncf %39 : vector<64x128xf32> to vector<64x128xbf16>
    %cst_12 = arith.constant dense<0.000000e+00> : vector<64x128xf32>
    %41 = tpu.matmul %26, %40, %cst_12 {dimension_numbers = #tpu.dot_dimension_numbers<[1], [0], [0], [1], [0, 0, 1, 1], [], []>} : vector<64x64xbf16>, vector<64x128xbf16>, vector<64x128xf32> -> vector<64x128xf32>
    %cst_13 = arith.constant 0.000000e+00 : f32
    %42 = vector.shape_cast %18 : vector<1x128xi1> to vector<1x128xi1>
    %43 = vector.broadcast %42 : vector<1x128xi1> to vector<64x128xi1>
    %44 = vector.broadcast %cst_13 : f32 to vector<64x128xf32>
    %45 = arith.select %43, %41, %44 : vector<64x128xi1>, vector<64x128xf32>
    %cst_14 = arith.constant dense<0.000000e+00> : vector<64xf32>
    %46 = vector.multi_reduction <add>, %45, %cst_14 [1] : vector<64x128xf32> to vector<64xf32>
    %47 = vector.shape_cast %46 : vector<64xf32> to vector<64x1xf32>
    %cst_15 = arith.constant 9.99999971E-10 : f32
    %48 = vector.broadcast %cst_15 : f32 to vector<64x1xf32>
    %49 = arith.addf %48, %47 : vector<64x1xf32>
    %50 = tpu.reciprocal %49 {approx = true} : vector<64x1xf32> -> vector<64x1xf32>
    %51 = vector.broadcast %50 : vector<64x1xf32> to vector<64x128xf32>
    %52 = arith.mulf %41, %51 : vector<64x128xf32>
    %c0_16 = arith.constant 0 : index
    %c0_17 = arith.constant 0 : index
    %c0_18 = arith.constant 0 : index
    %53 = vector.load %arg1[%c0_16, %c0_17, %c0_18] : memref<2x64x128xf32, #tpu.memory_space<vmem>>, vector<1x64x128xf32>
    %54 = vector.shape_cast %53 : vector<1x64x128xf32> to vector<64x128xf32>
    %c0_19 = arith.constant 0 : index
    %c0_20 = arith.constant 0 : index
    %c0_21 = arith.constant 0 : index
    %55 = vector.load %arg2[%c0_19, %c0_20, %c0_21] : memref<2x64x128xf32, #tpu.memory_space<vmem>>, vector<1x64x128xf32>
    %56 = vector.shape_cast %55 : vector<1x64x128xf32> to vector<64x128xf32>
    %57 = arith.addf %54, %56 : vector<64x128xf32>
    %58 = arith.subf %57, %52 : vector<64x128xf32>
    %59 = arith.truncf %58 : vector<64x128xf32> to vector<64x128xbf16>
    %c0_22 = arith.constant 0 : index
    %c256 = arith.constant 256 : index
    %60 = vector.load %arg3[%c0_22, %c256] : memref<128x384xbf16, #tpu.memory_space<vmem>>, vector<128x128xbf16>
    %cst_23 = arith.constant dense<0.000000e+00> : vector<64x128xf32>
    %61 = tpu.matmul %59, %60, %cst_23 {dimension_numbers = #tpu.dot_dimension_numbers<[1], [0], [0], [1], [0, 0, 1, 1], [], []>} : vector<64x128xbf16>, vector<128x128xbf16>, vector<64x128xf32> -> vector<64x128xf32>
    %c0_24 = arith.constant 0 : index
    %c0_25 = arith.constant 0 : index
    %c0_26 = arith.constant 0 : index
    %62 = vector.load %arg1[%c0_24, %c0_25, %c0_26] : memref<2x64x128xf32, #tpu.memory_space<vmem>>, vector<1x64x128xf32>
    %63 = vector.shape_cast %62 : vector<1x64x128xf32> to vector<64x128xf32>
    %64 = vector.broadcast %2 : vector<1x128xf32> to vector<64x128xf32>
    %65 = arith.mulf %61, %64 : vector<64x128xf32>
    %66 = vector.broadcast %3 : vector<1x128xf32> to vector<64x128xf32>
    %67 = arith.addf %65, %66 : vector<64x128xf32>
    %cst_27 = arith.constant 0.000000e+00 : f32
    %68 = vector.broadcast %cst_27 : f32 to vector<64x128xf32>
    %69 = arith.maximumf %67, %68 : vector<64x128xf32>
    %70 = arith.addf %63, %69 : vector<64x128xf32>
    %c0_28 = arith.constant 0 : index
    %c0_29 = arith.constant 0 : index
    %c0_30 = arith.constant 0 : index
    %71 = vector.load %arg5[%c0_28, %c0_29, %c0_30] : memref<2x64x128xf32, #tpu.memory_space<vmem>>, vector<1x64x128xf32>
    %72 = vector.shape_cast %71 : vector<1x64x128xf32> to vector<64x128xf32>
    %73 = vector.shape_cast %70 : vector<64x128xf32> to vector<1x64x128xf32>
    tpu.vector_store %arg5[%c0_28, %c0_29, %c0_30], %73 {strides = array<i32>} : memref<2x64x128xf32, #tpu.memory_space<vmem>>, vector<1x64x128xf32>,
    %74 = vector.extract_strided_slice %12 {offsets = [64, 0], sizes = [64, 128], strides = [1, 1]} : vector<128x128xbf16> to vector<64x128xbf16>
    %cst_31 = arith.constant dense<0.000000e+00> : vector<64x64xf32>
    %75 = tpu.matmul %74, %74, %cst_31 {dimension_numbers = #tpu.dot_dimension_numbers<[1], [1], [0], [0], [0, 0, 1, 0], [], []>} : vector<64x128xbf16>, vector<64x128xbf16>, vector<64x64xf32> -> vector<64x64xf32>
    %cst_32 = arith.constant dense<0xFF800000> : vector<64xf32>
    %76 = vector.multi_reduction <maximumf>, %75, %cst_32 [0] : vector<64x64xf32> to vector<64xf32>
    %77 = vector.shape_cast %76 : vector<64xf32> to vector<1x64xf32>
    %78 = vector.broadcast %77 : vector<1x64xf32> to vector<64x64xf32>
    %79 = arith.subf %75, %78 : vector<64x64xf32>
    %80 = arith.truncf %79 : vector<64x64xf32> to vector<64x64xbf16>
    %81 = math.exp %80 : vector<64x64xbf16>
    %82 = arith.extf %81 : vector<64x64xbf16> to vector<64x64xf32>
    %cst_33 = arith.constant dense<0.000000e+00> : vector<64xf32>
    %83 = vector.multi_reduction <add>, %82, %cst_33 [0] : vector<64x64xf32> to vector<64xf32>
    %84 = vector.shape_cast %83 : vector<64xf32> to vector<1x64xf32>
    %85 = tpu.reciprocal %84 {approx = true} : vector<1x64xf32> -> vector<1x64xf32>
    %86 = vector.shape_cast %85 : vector<1x64xf32> to vector<64x1xf32>
    %87 = vector.extract_strided_slice %15 {offsets = [64, 0], sizes = [64, 128], strides = [1, 1]} : vector<128x128xf32> to vector<64x128xf32>
    %88 = vector.broadcast %86 : vector<64x1xf32> to vector<64x128xf32>
    %89 = arith.mulf %87, %88 : vector<64x128xf32>
    %90 = vector.shape_cast %18 : vector<1x128xi1> to vector<1x128xi1>
    %91 = vector.broadcast %90 : vector<1x128xi1> to vector<64x128xi1>
    %92 = vector.shape_cast %86 : vector<64x1xf32> to vector<64x1xf32>
    %93 = vector.broadcast %92 : vector<64x1xf32> to vector<64x128xf32>
    %94 = arith.select %91, %93, %89 : vector<64x128xi1>, vector<64x128xf32>
    %95 = arith.truncf %94 : vector<64x128xf32> to vector<64x128xbf16>
    %cst_34 = arith.constant dense<0.000000e+00> : vector<64x128xf32>
    %96 = tpu.matmul %81, %95, %cst_34 {dimension_numbers = #tpu.dot_dimension_numbers<[1], [0], [0], [1], [0, 0, 1, 1], [], []>} : vector<64x64xbf16>, vector<64x128xbf16>, vector<64x128xf32> -> vector<64x128xf32>
    %cst_35 = arith.constant 0.000000e+00 : f32
    %97 = vector.shape_cast %18 : vector<1x128xi1> to vector<1x128xi1>
    %98 = vector.broadcast %97 : vector<1x128xi1> to vector<64x128xi1>
    %99 = vector.broadcast %cst_35 : f32 to vector<64x128xf32>
    %100 = arith.select %98, %96, %99 : vector<64x128xi1>, vector<64x128xf32>
    %cst_36 = arith.constant dense<0.000000e+00> : vector<64xf32>
    %101 = vector.multi_reduction <add>, %100, %cst_36 [1] : vector<64x128xf32> to vector<64xf32>
    %102 = vector.shape_cast %101 : vector<64xf32> to vector<64x1xf32>
    %cst_37 = arith.constant 9.99999971E-10 : f32
    %103 = vector.broadcast %cst_37 : f32 to vector<64x1xf32>
    %104 = arith.addf %103, %102 : vector<64x1xf32>
    %105 = tpu.reciprocal %104 {approx = true} : vector<64x1xf32> -> vector<64x1xf32>
    %106 = vector.broadcast %105 : vector<64x1xf32> to vector<64x128xf32>
    %107 = arith.mulf %96, %106 : vector<64x128xf32>
    %c1 = arith.constant 1 : index
    %c0_38 = arith.constant 0 : index
    %c0_39 = arith.constant 0 : index
    %108 = vector.load %arg1[%c1, %c0_38, %c0_39] : memref<2x64x128xf32, #tpu.memory_space<vmem>>, vector<1x64x128xf32>
    %109 = vector.shape_cast %108 : vector<1x64x128xf32> to vector<64x128xf32>
    %c1_40 = arith.constant 1 : index
    %c0_41 = arith.constant 0 : index
    %c0_42 = arith.constant 0 : index
    %110 = vector.load %arg2[%c1_40, %c0_41, %c0_42] : memref<2x64x128xf32, #tpu.memory_space<vmem>>, vector<1x64x128xf32>
    %111 = vector.shape_cast %110 : vector<1x64x128xf32> to vector<64x128xf32>
    %112 = arith.addf %109, %111 : vector<64x128xf32>
    %113 = arith.subf %112, %107 : vector<64x128xf32>
    %114 = arith.truncf %113 : vector<64x128xf32> to vector<64x128xbf16>
    %c0_43 = arith.constant 0 : index
    %c256_44 = arith.constant 256 : index
    %115 = vector.load %arg3[%c0_43, %c256_44] : memref<128x384xbf16, #tpu.memory_space<vmem>>, vector<128x128xbf16>
    %cst_45 = arith.constant dense<0.000000e+00> : vector<64x128xf32>
    %116 = tpu.matmul %114, %115, %cst_45 {dimension_numbers = #tpu.dot_dimension_numbers<[1], [0], [0], [1], [0, 0, 1, 1], [], []>} : vector<64x128xbf16>, vector<128x128xbf16>, vector<64x128xf32> -> vector<64x128xf32>
    %c1_46 = arith.constant 1 : index
    %c0_47 = arith.constant 0 : index
    %c0_48 = arith.constant 0 : index
    %117 = vector.load %arg1[%c1_46, %c0_47, %c0_48] : memref<2x64x128xf32, #tpu.memory_space<vmem>>, vector<1x64x128xf32>
    %118 = vector.shape_cast %117 : vector<1x64x128xf32> to vector<64x128xf32>
    %119 = vector.broadcast %2 : vector<1x128xf32> to vector<64x128xf32>
    %120 = arith.mulf %116, %119 : vector<64x128xf32>
    %121 = vector.broadcast %3 : vector<1x128xf32> to vector<64x128xf32>
    %122 = arith.addf %120, %121 : vector<64x128xf32>
    %cst_49 = arith.constant 0.000000e+00 : f32
    %123 = vector.broadcast %cst_49 : f32 to vector<64x128xf32>
    %124 = arith.maximumf %122, %123 : vector<64x128xf32>
    %125 = arith.addf %118, %124 : vector<64x128xf32>
    %c1_50 = arith.constant 1 : index
    %c0_51 = arith.constant 0 : index
    %c0_52 = arith.constant 0 : index
    %126 = vector.load %arg5[%c1_50, %c0_51, %c0_52] : memref<2x64x128xf32, #tpu.memory_space<vmem>>, vector<1x64x128xf32>
    %127 = vector.shape_cast %126 : vector<1x64x128xf32> to vector<64x128xf32>
    %128 = vector.shape_cast %125 : vector<64x128xf32> to vector<1x64x128xf32>
    tpu.vector_store %arg5[%c1_50, %c0_51, %c0_52], %128 {strides = array<i32>} : memref<2x64x128xf32, #tpu.memory_space<vmem>>, vector<1x64x128xf32>,
    return
  }
  func.func @transform_0(%arg0: i32) -> (i32, i32, i32) {
    %c0_i32 = arith.constant 0 : i32
    %c0_i32_0 = arith.constant 0 : i32
    %c0_i32_1 = arith.constant 0 : i32
    return %arg0, %c0_i32, %c0_i32_0 : i32, i32, i32
  }
  func.func @transform_1(%arg0: i32) -> (i32, i32, i32) {
    %c0_i32 = arith.constant 0 : i32
    %c0_i32_0 = arith.constant 0 : i32
    %c0_i32_1 = arith.constant 0 : i32
    return %arg0, %c0_i32, %c0_i32_0 : i32, i32, i32
  }
  func.func @transform_2(%arg0: i32) -> (i32, i32) {
    %c0_i32 = arith.constant 0 : i32
    %c0_i32_0 = arith.constant 0 : i32
    %c0_i32_1 = arith.constant 0 : i32
    return %c0_i32, %c0_i32_0 : i32, i32
  }
  func.func @transform_3(%arg0: i32) -> (i32, i32) {
    %c0_i32 = arith.constant 0 : i32
    %c0_i32_0 = arith.constant 0 : i32
    %c0_i32_1 = arith.constant 0 : i32
    return %c0_i32, %c0_i32_0 : i32, i32
  }
  func.func @transform_4(%arg0: i32) -> (i32, i32, i32) {
    %c0_i32 = arith.constant 0 : i32
    %c0_i32_0 = arith.constant 0 : i32
    %c0_i32_1 = arith.constant 0 : i32
    return %arg0, %c0_i32, %c0_i32_0 : i32, i32, i32
  }
}

</mosaic_0001>

<bundles_post_ra>
// kernel: tpu_custom_call.1
= control target key start
LH: loop header
LB: loop body
LE: loop exit
PB: predicated region body
PF: predicated region fallthrough
CT: control target
= control target key end

     0   :  { %s3148_s0 = inlined_call_operand.hbm [shape: f32[4,64,128], index: 0, kind: input, shape index: {}]   ;;  %s3149_s1 = inlined_call_operand.hbm [shape: f32[4,64,128], index: 1, kind: input, shape index: {}]   ;;  %s3150_s2 = inlined_call_operand.hbm [shape: bf16[128,384], index: 2, kind: input, shape index: {}]   ;;  %s3151_s3 = inlined_call_operand.vmem [shape: f32[3,128], index: 3, kind: input, shape index: {}]   ;;  %s3152_s4 = inlined_call_operand.hbm [shape: f32[4,64,128], index: 4, kind: output, shape index: {}]  }
   0x1   :  { %3156 = sst [smem:[#allocation13_spill]] %s3148_s0 }
   0x2   :  { %9 = vsyncpa [#allocation3], 0 }
   0x3   :  { %11 = vsyncpa [#allocation3 + $0x1], 0 }
   0x4   :  { %12 = vsyncpa [#allocation6], 0 }
   0x5   :  { %14 = vsyncpa [#allocation6 + $0x1], 0 }
   0x6   :  { %15 = vsyncpa [#allocation4], 0 }
   0x7   :  { %17 = vsyncpa [#allocation4 + $0x1], 0  ;;  %s2395_s15 = smov 0   ;;  %s2397_s16 = smov 0  }
   0x8   :  { %s2399_s17 = smov 0   ;;  %s2401_s18 = smov 0  }
   0x9 LB: > { %s2416_s19 = sadd.s32 4294967295, %s2357_s18   ;;  %s1749_s20 = sadd.s32 4294967294, %s2357_s18   ;;  %s2357_s18 = sphi %s2401_s18, %s3174_s18   ;;  %s2353_s17 = sphi %s2399_s17, %s3173_s17   ;;  %s2349_s16 = sphi %s2397_s16, %s3172_s16   ;;  %s2345_s15 = sphi %s2395_s15, %s3171_s15  }
   0xa   : > { %p43_p0 = scmp.ne.s32.totalorder %s2349_s16, %s2345_s15  ;;  %p3153_p1 = scmp.eq.s32.totalorder %s2416_s19, 0 }
   0xb   : > { %p141_p3 = scmp.eq.s32.totalorder %s1749_s20, 1  ;;  %p1750_p5 = scmp.ge.s32.totalorder %s2357_s18, 1 }
   0xc   : > { %p2425_p4 = por %p3153_p1, %p43_p0  ;;  %p148_p7 = scmp.lt.s32.totalorder %s2357_s18, 3 }
   0xd   : > { %p2430_p6 = por %p141_p3, %p43_p0  ;;  %s2359_s24 = smov [#allocation7]  }
   0xe   : > { %s3157_s21 = scalar_select %p2425_p4, 1, 0 }
   0xf   : > { %s3158_s22 = scalar_select %p2430_p6, 1, 0 }
  0x10   : > { %p2435_p8 = pnand %p1750_p5, %p148_p7  ;;  %s160_s25 = sshll.u32 %s2359_s24, 4  ;;  %s2439_s25 = int_to_ptr.vmem [resolvable:$true] %s160_s25 }
  0x11   : > { %s2451_s27 = sadd.s32 1, %s2357_s18   ;;  %s30_s28 = sadd.s32 1, %s2353_s17 }
  0x12   : > { %s3159_s23 = scalar_select %p2435_p8, 1, 0 }
  0x13   : > { %p2036_p9 = pneg %p2435_p8  ;;  %s27_s29 = ssub.s32 %s2357_s18, %s2451_s27 }
  0x14   : > { %s2195_s6 = scalar_lea.hbm %s3150_s2, 3072 }
  0x15   : > { %p2446_p11 = pnand %p2036_p9, %p3153_p1  ;;  %p2196_p12 = scmp.ne.s32.totalorder %s3150_s2, %s2195_s6 }
  0x16   : > { %p2202_p5 = scmp.lt.u32.totalorder %s2195_s6, %s3150_s2 }
  0x17   : > { %p2197_p13 = pneg %p2446_p11 }
  0x19   : > { %p2198_p0 = pnand %p2197_p13, %p2196_p12 }
  0x1b   : > { %p2199_p3 = pneg %p2198_p0 }
  0x1d   : > { %p2204_p7 = pnand %p2202_p5, %p2199_p3 }
  0x1f   : > { %2207 = shalt.err (!%p2204_p7)
}
  0x20   : > { %s2208_s11 = scalar_lea.vmem %s2439_s25, 3072  ;;  %p2216_p2 = scmp.lt.s32.totalorder %s2439_s25, %s2439_s25 }
  0x21   : > { %p2209_p9 = scmp.ne.s32.totalorder %s2439_s25, %s2208_s11  ;;  %p2217_p6 = scmp.lt.s32.totalorder %s2208_s11, %s2208_s11 }
  0x23   : > { %p2211_p10 = pnand %p2209_p9, %p2197_p13  ;;  %p2218_p4 = por %p2217_p6, %p2216_p2 }
  0x25   : > { %p2212_p1 = pneg %p2211_p10 }
  0x27   : > { %p2219_p8 = pnand %p2218_p4, %p2212_p1 }
  0x29   : > { %2222 = shalt.err (!%p2219_p8)
}
  0x2a   : > { %s2360_s12 = smov 192   ;;  %s2361_s13 = smov 12  }
  0x2b   : > { %2039 = dma.hbm_to_vmem [thread:$0]  (!%p2446_p11), %s3150_s2, 3072, %s2439_s25, [#allocation6], %s2360_s12, %s2360_s12, %s2361_s13  }
  0x2c   : > { %p28_p1 = scmp.eq.s32.totalorder %s27_s29, 0  ;;  %p37_p2 = scmp.ne.s32.totalorder %s2353_s17, %s2349_s16 }
  0x2d   : > { %p38_p4 = scmp.eq.s32.totalorder %s2357_s18, 0  ;;  %p2052_p6 = scmp.lt.s32.totalorder %s2357_s18, 2 }
  0x2e   : > { %s2482_s24 = scalar_select %p28_p1, %s2353_s17, %s30_s28  }
  0x2f   : > { %p39_p8 = por %p38_p4, %p37_p2  ;;  %p3161_p10 = scmp.eq.s32.totalorder %s2416_s19, 1 }
  0x30   : > { %s177_s5 = sand.u32 1, %s2353_s17   ;;  %s1837_s6 = sshll.u32 %s2357_s18, 11 }
  0x31   : > { %p2486_p12 = por %p3161_p10, %p37_p2  ;;  %s2492_s7 = sshll.u32 %s177_s5, 7 }
  0x32   : > { %s3163_s0 = sld [smem:[#allocation13_spill]]  ;;  %s181_s28 = scalar_lea.vmem [#allocation2], %s2492_s7 }
  0x33   : > { %s189_s29 = sshll.u32 %s181_s28, 4  ;;  %p2502_p11 = pnand %p2052_p6, %p39_p8  ;;  %s2506_s29 = int_to_ptr.vmem [resolvable:$true] %s189_s29 }
  0x34   : > { %s2508_s10 = scalar_lea.sflag [#allocation3], %s177_s5 }
  0x35   : > { %p2225_p0 = pneg %p2502_p11 }
  0x38   : > { %s2499_s25 = scalar_lea.hbm %s3163_s0, %s1837_s6  ;;  %s2228_s14 = scalar_lea.hbm %s3163_s0, 4096 }
  0x39   : > { %s2223_s11 = scalar_lea.hbm %s2499_s25, 2048  ;;  %p2229_p7 = scmp.lt.u32.totalorder %s2499_s25, %s3163_s0 }
  0x3a   : > { %p2224_p13 = scmp.ne.s32.totalorder %s2499_s25, %s2223_s11  ;;  %p2230_p9 = scmp.lt.u32.totalorder %s2228_s14, %s2223_s11 }
  0x3b   : > { %p2232_p2 = scmp.lt.u32.totalorder %s2223_s11, %s2499_s25 }
  0x3c   : > { %p2226_p3 = pnand %p2225_p0, %p2224_p13  ;;  %p2231_p1 = por %p2230_p9, %p2229_p7 }
  0x3e   : > { %p2227_p5 = pneg %p2226_p3  ;;  %p2233_p4 = por %p2232_p2, %p2231_p1 }
  0x40   : > { %p2234_p6 = pnand %p2233_p4, %p2227_p5 }
  0x42   : > { %2237 = shalt.err (!%p2234_p6)
}
  0x43   : > { %s2238_s5 = scalar_lea.vmem %s2506_s29, 2048  ;;  %s2362_s8 = smov [#allocation2]  }
  0x44   : > { %p2239_p8 = scmp.ne.s32.totalorder %s2506_s29, %s2238_s5  ;;  %s2243_s28 = sshll.u32 %s2362_s8, 4  ;;  %s2244_s28 = int_to_ptr.vmem [resolvable:$false] %s2243_s28 }
  0x45   : > { %s2245_s12 = scalar_lea.vmem %s2244_s28, 4096  ;;  %p2246_p3 = scmp.lt.s32.totalorder %s2506_s29, %s2244_s28 }
  0x46   : > { %p2241_p10 = pnand %p2239_p8, %p2225_p0  ;;  %p2247_p7 = scmp.lt.s32.totalorder %s2245_s12, %s2238_s5 }
  0x48   : > { %p2242_p13 = pneg %p2241_p10  ;;  %p2248_p9 = por %p2247_p7, %p2246_p3 }
  0x4a   : > { %p2249_p1 = pnand %p2248_p9, %p2242_p13 }
  0x4c   : > { %2252 = shalt.err (!%p2249_p1)
}
  0x4d   : > { %s2363_s11 = smov 128   ;;  %s2364_s13 = smov 8  }
  0x4e   : > { %2043 = dma.hbm_to_vmem [thread:$0]  (!%p2502_p11), %s2499_s25, 2048, %s2506_s29, %s2508_s10, %s2363_s11, %s2363_s11, %s2364_s13  }
  0x4f   : > { %s2544_s26 = scalar_lea.hbm %s3149_s1, %s1837_s6  ;;  %s203_s5 = scalar_lea.vmem [#allocation5], %s2492_s7 }
  0x50   : > { %s211_s8 = sshll.u32 %s203_s5, 4  ;;  %s199_s28 = sand.u32 1, %s2357_s18   ;;  %s2548_s8 = int_to_ptr.vmem [resolvable:$true] %s211_s8 }
  0x51   : > { %s2550_s12 = scalar_lea.sflag [#allocation6], %s199_s28  ;;  %s2253_s0 = scalar_lea.hbm %s2544_s26, 2048 }
  0x52   : > { %p2254_p5 = scmp.ne.s32.totalorder %s2544_s26, %s2253_s0  ;;  %s2258_s29 = scalar_lea.hbm %s3149_s1, 4096 }
  0x53   : > { %p2259_p6 = scmp.lt.u32.totalorder %s2544_s26, %s3149_s1  ;;  %p2260_p8 = scmp.lt.u32.totalorder %s2258_s29, %s2253_s0 }
  0x54   : > { %p2256_p2 = pnand %p2254_p5, %p2225_p0  ;;  %p2262_p13 = scmp.lt.u32.totalorder %s2253_s0, %s2544_s26 }
  0x55   : > { %p2261_p10 = por %p2260_p8, %p2259_p6 }
  0x56   : > { %p2257_p4 = pneg %p2256_p2 }
  0x57   : > { %p2263_p3 = por %p2262_p13, %p2261_p10 }
  0x59   : > { %p2264_p7 = pnand %p2263_p3, %p2257_p4 }
  0x5b   : > { %2267 = shalt.err (!%p2264_p7)
}
  0x5c   : > { %s2268_s7 = scalar_lea.vmem %s2548_s8, 2048  ;;  %s2365_s20 = smov [#allocation5]  }
  0x5d   : > { %p2269_p9 = scmp.ne.s32.totalorder %s2548_s8, %s2268_s7  ;;  %s2273_s5 = sshll.u32 %s2365_s20, 4  ;;  %s2274_s5 = int_to_ptr.vmem [resolvable:$false] %s2273_s5 }
  0x5e   : > { %s2275_s28 = scalar_lea.vmem %s2274_s5, 4096  ;;  %p2276_p2 = scmp.lt.s32.totalorder %s2548_s8, %s2274_s5 }
  0x5f   : > { %p2271_p1 = pnand %p2269_p9, %p2225_p0  ;;  %p2277_p6 = scmp.lt.s32.totalorder %s2275_s28, %s2268_s7 }
  0x61   : > { %p2272_p5 = pneg %p2271_p1  ;;  %p2278_p8 = por %p2277_p6, %p2276_p2 }
  0x63   : > { %p2279_p10 = pnand %p2278_p8, %p2272_p5 }
  0x65   : > { %2282 = shalt.err (!%p2279_p10)
}
  0x66   : > { %2046 = dma.hbm_to_vmem [thread:$0]  (!%p2502_p11), %s2544_s26, 2048, %s2548_s8, %s2550_s12, %s2363_s11, %s2363_s11, %s2364_s13  }
  0x67   : > { %p3165_p0 = scmp.ne.s32.totalorder %s3159_s23, 0 }
  0x68   : > { %s2582_s0 = sand.u32 (!%p3165_p0), 1, %s2349_s16   ;;  %p3166_p4 = scmp.ne.s32.totalorder (!%p3165_p0), %s3157_s21, 0 }
  0x69   : > { %223 = sbr.rel (%p3165_p0) target bundleno = 1869 (0x74d), region = 36  ;;  %s2585_s25 = sshll.u32 (!%p3165_p0), %s2582_s0, 7 }
  0x6a   : > { %s226_s9 = scalar_lea.sflag (!%p3165_p0), [#allocation3], %s2582_s0  ;;  %s2589_s6 = scalar_lea.vmem (!%p3165_p0), [#allocation2], %s2585_s25 }
  0x70   : > { %2328 = dma.done.wait (%p3166_p4), %s226_s9, 2048  }
  0x71   : > { %2330 = vsyncadd (%p3166_p4), %s226_s9, 4294965248  ;;  %s234_s23 = sand.u32 1, %s2416_s19   ;;  %s2597_s13 = scalar_lea.vmem [#allocation5], %s2585_s25 }
  0x72   : > { %s235_s11 = scalar_lea.sflag [#allocation6], %s234_s23 }
  0x73   : > { %2332 = dma.done.wait (%p3166_p4), %s235_s11, 2048  }
  0x74   : > { %2334 = vsyncadd (%p3166_p4), %s235_s11, 4294965248  ;;  %p3167_p11 = scmp.eq.s32.totalorder %s2416_s19, 0 }
  0x76   : > { %2336 = dma.done.wait (%p3167_p11), [#allocation6], 3072   ;;  %p3168_p13 = pmov %p3167_p11 }
  0x77   : > { %v2366_v0 = vmov 0   ;;  %v2095_v1 = vld [vmem:[#allocation7 + $0x4] ss:$12 sps:$4 sm:$0xff]   ;;  %v2097_v2 = vld [vmem:[#allocation7] ss:$12 sps:$4 sm:$0xff]   ;;  %v280_v24 = vld [vmem:[%s2589_s6 + $0x18] sm:$0xff] }
  0x78   : > { %2338 = vsyncadd (%p3168_p13), [#allocation6], 4294964224  ;;  %461 = vmatprep.mubr.bf16.mxu0 %v2366_v0  ;;  %429 = vmatprep.subr.bf16.mxu0 %v2095_v1  ;;  %v2098_v3 = vld [vmem:[#allocation7 + $0x1c] ss:$12 sps:$4 sm:$0xff]   ;;  %v2100_v4 = vld [vmem:[#allocation7 + $0x18] ss:$12 sps:$4 sm:$0xff]  }
  0x79   : > { %430 = vmatpush1.bf16.msra.mxu0 %v2097_v2  ;;  %v2101_v5 = vld [vmem:[#allocation7 + $0x34] ss:$12 sps:$4 sm:$0xff]   ;;  %v2103_v6 = vld [vmem:[#allocation7 + $0x30] ss:$12 sps:$4 sm:$0xff]   ;;  %v2104_v7 = vld [vmem:[#allocation7 + $0x4c] ss:$12 sps:$4 sm:$0xff]  }
  0x7a   : > { %431 = vmatprep.subr.bf16.mxu0 %v2098_v3  ;;  %v2106_v8 = vld [vmem:[#allocation7 + $0x48] ss:$12 sps:$4 sm:$0xff]   ;;  %v2107_v9 = vld [vmem:[#allocation7 + $0x64] ss:$12 sps:$4 sm:$0xff]   ;;  %v2109_v10 = vld [vmem:[#allocation7 + $0x60] ss:$12 sps:$4 sm:$0xff]  }
  0x7b   : > { %v2110_v11 = vld [vmem:[#allocation7 + $0x7c] ss:$12 sps:$4 sm:$0xff]   ;;  %v2112_v12 = vld [vmem:[#allocation7 + $0x78] ss:$12 sps:$4 sm:$0xff]   ;;  %v2113_v13 = vld [vmem:[#allocation7 + $0x94] ss:$12 sps:$4 sm:$0xff]  }
  0x7c   : > { %v2115_v14 = vld [vmem:[#allocation7 + $0x90] ss:$12 sps:$4 sm:$0xff]   ;;  %v277_v15 = vld [vmem:[%s2589_s6] sm:$0xff]  ;;  %v278_v16 = vld [vmem:[%s2589_s6 + $0x8] sm:$0xff]  ;;  %vm638_vm0 = vcmask 523264   ;;  %s2957_s8 = scalar_lea.vmem [#allocation8], %s2585_s25 }
  0x7d   : > { %432 = vmatpush1.bf16.msra.mxu0 %v2100_v4  ;;  %v293_v17 = vld [vmem:[%s2597_s13] sm:$0xff]  ;;  %v294_v18 = vld [vmem:[%s2597_s13 + $0x8] sm:$0xff]  ;;  %v279_v23 = vld [vmem:[%s2589_s6 + $0x10] sm:$0xff]  ;;  %s1841_s12 = sshll.u32 %s2416_s19, 11  ;;  %s1644_s29 = sshll.u32 %s2957_s8, 4  ;;  %s3100_s29 = int_to_ptr.vmem [resolvable:$true] %s1644_s29 }
  0x7e   : > { %433 = vmatprep.subr.bf16.mxu0 %v2101_v5  ;;  %v2116_v19 = vld [vmem:[#allocation7 + $0xac] ss:$12 sps:$4 sm:$0xff]   ;;  %v2118_v20 = vld [vmem:[#allocation7 + $0xa8] ss:$12 sps:$4 sm:$0xff]   ;;  %v2612_v21 = vadd.f32 %v293_v17, %v277_v15  ;;  %v2614_v22 = vadd.f32 %v294_v18, %v278_v16  ;;  %v281_v31 = vld [vmem:[%s2589_s6 + $0x20] sm:$0xff]  ;;  %s3098_s7 = scalar_lea.hbm %s3152_s4, %s1841_s12  ;;  %s1630_s19 = scalar_lea.sflag [#allocation4], %s2582_s0 }
  0x7f   : > { %v295_v25 = vld [vmem:[%s2597_s13 + $0x10] sm:$0xff]  ;;  %v296_v26 = vld [vmem:[%s2597_s13 + $0x18] sm:$0xff]  ;;  %v282_v32 = vld [vmem:[%s2589_s6 + $0x28] sm:$0xff]  ;;  %s2283_s20 = scalar_lea.vmem %s3100_s29, 2048  ;;  %s2367_s5 = smov [#allocation8]  }
  0x80   : > { %v325_v27 = vpack.c.bf16 %v2614_v22, %v2612_v21  ;;  %v2622_v28 = vadd.f32 %v295_v25, %v279_v23  ;;  %v2624_v29 = vadd.f32 %v296_v26, %v280_v24  ;;  %v297_v33 = vld [vmem:[%s2597_s13 + $0x20] sm:$0xff]  ;;  %v298_v34 = vld [vmem:[%s2597_s13 + $0x28] sm:$0xff]  ;;  %v283_v38 = vld [vmem:[%s2589_s6 + $0x30] sm:$0xff]  ;;  %p2284_p3 = scmp.ne.s32.totalorder %s3100_s29, %s2283_s20  ;;  %s2287_s28 = sshll.u32 %s2367_s5, 4  ;;  %s2288_s28 = int_to_ptr.vmem [resolvable:$false] %s2287_s28 }
  0x81   : > { %434 = vmatpush1.bf16.msra.mxu0 %v2103_v6  ;;  %v2633_v35 = vadd.f32 %v297_v33, %v281_v31  ;;  %v2635_v36 = vadd.f32 %v298_v34, %v282_v32  ;;  %v284_v39 = vld [vmem:[%s2589_s6 + $0x38] sm:$0xff]  ;;  %v299_v40 = vld [vmem:[%s2597_s13 + $0x30] sm:$0xff]  ;;  %v285_v45 = vld [vmem:[%s2589_s6 + $0x40] sm:$0xff]  ;;  %s2289_s25 = scalar_lea.vmem %s2288_s28, 4096  ;;  %p2290_p1 = scmp.lt.s32.totalorder %s3100_s29, %s2288_s28 }
  0x82   : > { %435 = vmatprep.subr.bf16.mxu0 %v2104_v7  ;;  %v326_v30 = vpack.c.bf16 %v2624_v29, %v2622_v28  ;;  %v300_v41 = vld [vmem:[%s2597_s13 + $0x38] sm:$0xff]  ;;  %v2644_v42 = vadd.f32 %v299_v40, %v283_v38  ;;  %v286_v46 = vld [vmem:[%s2589_s6 + $0x48] sm:$0xff]  ;;  %v301_v47 = vld [vmem:[%s2597_s13 + $0x40] sm:$0xff]  ;;  %p2285_p7 = pnand %p2284_p3, %p2486_p12  ;;  %p2291_p5 = scmp.lt.s32.totalorder %s2289_s25, %s2283_s20 }
  0x83   : > { %v327_v37 = vpack.c.bf16 %v2635_v36, %v2633_v35  ;;  %v2646_v43 = vadd.f32 %v300_v41, %v284_v39  ;;  %v302_v48 = vld [vmem:[%s2597_s13 + $0x48] sm:$0xff]  ;;  %v317_v49 = vadd.f32 %v301_v47, %v285_v45  ;;  %v287_v52 = vld [vmem:[%s2589_s6 + $0x50] sm:$0xff]  ;;  %v288_v53 = vld [vmem:[%s2589_s6 + $0x58] sm:$0xff] }
  0x84   : > { %v318_v50 = vadd.f32 %v302_v48, %v286_v46  ;;  %v303_v54 = vld [vmem:[%s2597_s13 + $0x50] sm:$0xff]  ;;  %v304_v55 = vld [vmem:[%s2597_s13 + $0x58] sm:$0xff]  ;;  %v289_v59 = vld [vmem:[%s2589_s6 + $0x60] sm:$0xff]  ;;  %p2286_p9 = pneg %p2285_p7  ;;  %p2292_p2 = por %p2291_p5, %p2290_p1 }
  0x85   : > { %436 = vmatpush1.bf16.msra.mxu0 %v2106_v8  ;;  %v328_v44 = vpack.c.bf16 %v2646_v43, %v2644_v42  ;;  %v319_v56 = vadd.f32 %v303_v54, %v287_v52  ;;  %v320_v57 = vadd.f32 %v304_v55, %v288_v53  ;;  %v290_v60 = vld [vmem:[%s2589_s6 + $0x68] sm:$0xff]  ;;  %v305_v61 = vld [vmem:[%s2597_s13 + $0x60] sm:$0xff]  ;;  %v291_v3 = vld [vmem:[%s2589_s6 + $0x70] sm:$0xff] }
  0x86   : > { %437 = vmatprep.subr.bf16.mxu0 %v2107_v9  ;;  %v329_v51 = vpack.c.bf16 %v318_v50, %v317_v49  ;;  %v306_v62 = vld [vmem:[%s2597_s13 + $0x68] sm:$0xff]  ;;  %v321_v63 = vadd.f32 %v305_v61, %v289_v59  ;;  %v292_v4 = vld [vmem:[%s2589_s6 + $0x78] sm:$0xff]  ;;  %v307_v5 = vld [vmem:[%s2597_s13 + $0x70] sm:$0xff]  ;;  %p2293_p6 = pnand %p2292_p2, %p2286_p9 }
  0x87   : > { %v330_v58 = vpack.c.bf16 %v320_v57, %v319_v56  ;;  %v322_v1 = vadd.f32 %v306_v62, %v290_v60  ;;  %v308_v6 = vld [vmem:[%s2597_s13 + $0x78] sm:$0xff]  ;;  %v323_v7 = vadd.f32 %v307_v5, %v291_v3 }
  0x88   : > { %v324_v8 = vadd.f32 %v308_v6, %v292_v4 }
  0x89   : > { %438 = vmatpush1.bf16.msra.mxu0 %v2109_v10  ;;  %v331_v2 = vpack.c.bf16 %v322_v1, %v321_v63 }
  0x8a   : > { %439 = vmatprep.subr.bf16.mxu0 %v2110_v11  ;;  %v332_v9 = vpack.c.bf16 %v324_v8, %v323_v7 }
  0x8d   : > { %440 = vmatpush1.bf16.msra.mxu0 %v2112_v12 }
  0x8e   : > { %441 = vmatprep.subr.bf16.mxu0 %v2113_v13 }
  0x91   : > { %442 = vmatpush1.bf16.msra.mxu0 %v2115_v14 }
  0x92   : > { %443 = vmatprep.subr.bf16.mxu0 %v2116_v19 }
  0x95   : > { %444 = vmatpush1.bf16.msra.mxu0 %v2118_v20 }
  0x98   : > { %462 = vmatmul.mubr.bf16.vlgmr.msra.gmra.mrb[0].mxu0 %v325_v27 }
  0x99   : > { %471 = vmatprep.mubr.bf16.mxu0 %v2366_v0 }
  0xa0   : > { %472 = vmatmul.mubr.bf16.gmra.mrb[4].mxu0 %v326_v30 }
  0xa1   : > { %481 = vmatprep.mubr.bf16.mxu0 %v2366_v0 }
  0xa8   : > { %482 = vmatmul.mubr.bf16.gmra.mrb[8].mxu0 %v327_v37 }
  0xa9   : > { %491 = vmatprep.mubr.bf16.mxu0 %v2366_v0 }
  0xb0   : > { %492 = vmatmul.mubr.bf16.gmra.mrb[12].mxu0 %v328_v44 }
  0xb1   : > { %501 = vmatprep.mubr.bf16.mxu0 %v2366_v0 }
  0xb8   : > { %502 = vmatmul.mubr.bf16.gmra.mrb[16].mxu0 %v329_v51 }
  0xb9   : > { %511 = vmatprep.mubr.bf16.mxu0 %v2366_v0 }
  0xc0   : > { %512 = vmatmul.mubr.bf16.gmra.mrb[20].mxu0 %v330_v58 }
  0xc1   : > { %521 = vmatprep.mubr.bf16.mxu0 %v2366_v0 }
  0xc8   : > { %522 = vmatmul.mubr.bf16.gmra.mrb[24].mxu0 %v331_v2 }
  0xc9   : > { %531 = vmatprep.mubr.bf16.mxu0 %v2366_v0 }
  0xd0   : > { %532 = vmatmul.mubr.bf16.gmra.mrb[28].mxu0 %v332_v9 }
 0x16b   : > { %v463_v10 = vpop.f32.mrb[0].mxu0 }
 0x16c   : > { %v2671_v11 = vpop.f32.mrb[1].mxu0 }
 0x16d   : > { %v467_v12 = vpop.f32.mrb[2].mxu0 }
 0x16e   : > { %v542_v13 = vpack.c.bf16 %v467_v12, %v463_v10  ;;  %v2673_v14 = vpop.f32.mrb[3].mxu0 }
 0x170   : > { %1898 = vmatprep.subr.bf16.mxu1 %v542_v13  ;;  %1906 = vmatprep.mubr.bf16.mxu1 %v542_v13 }
 0x171   : > { %1899 = vmatpush3.bf16.xpose.msra.mxu1 %v542_v13 }
 0x173   : > { %v473_v15 = vpop.f32.mrb[4].mxu0 }
 0x174   : > { %v2675_v16 = vpop.f32.mrb[5].mxu0 }
 0x175   : > { %v477_v17 = vpop.f32.mrb[6].mxu0 }
 0x176   : > { %v543_v18 = vpack.c.bf16 %v477_v17, %v473_v15  ;;  %v2677_v19 = vpop.f32.mrb[7].mxu0 }
 0x178   : > { %1900 = vmatprep.subr.bf16.mxu1 %v543_v18 }
 0x179   : > { %1901 = vmatpush3.bf16.xpose.msra.mxu1 %v543_v18 }
 0x17b   : > { %v483_v0 = vpop.f32.mrb[8].mxu0 }
 0x17c   : > { %v2679_v20 = vpop.f32.mrb[9].mxu0 }
 0x17d   : > { %v487_v23 = vpop.f32.mrb[10].mxu0 }
 0x17e   : > { %v544_v24 = vpack.c.bf16 %v487_v23, %v483_v0  ;;  %v2681_v25 = vpop.f32.mrb[11].mxu0 }
 0x180   : > { %1902 = vmatprep.subr.bf16.mxu1 %v544_v24 }
 0x181   : > { %1903 = vmatpush3.bf16.xpose.msra.mxu1 %v544_v24 }
 0x183   : > { %v493_v26 = vpop.f32.mrb[12].mxu0 }
 0x184   : > { %v2683_v27 = vpop.f32.mrb[13].mxu0 }
 0x185   : > { %v497_v30 = vpop.f32.mrb[14].mxu0 }
 0x186   : > { %v545_v31 = vpack.c.bf16 %v497_v30, %v493_v26  ;;  %v2685_v32 = vpop.f32.mrb[15].mxu0 }
 0x188   : > { %1904 = vmatprep.subr.bf16.mxu1 %v545_v31 }
 0x189   : > { %1905 = vmatpush3.bf16.xpose.msra.mxu1 %v545_v31 }
 0x18b   : > { %v503_v33 = vpop.f32.mrb[16].mxu0 }
 0x18c   : > { %v2687_v34 = vpop.f32.mrb[17].mxu0 }
 0x18d   : > { %v507_v37 = vpop.f32.mrb[18].mxu0 }
 0x18e   : > { %v546_v38 = vpack.c.bf16 %v507_v37, %v503_v33  ;;  %v2689_v39 = vpop.f32.mrb[19].mxu0 }
 0x190   : > { %1907 = vmatmul.mubr.bf16.vlgmr.msra.gmra.mrb[0].mxu1 %v543_v18  ;;  %1954 = vmatprep.subr.bf16.mxu0 %v546_v38 }
 0x191   : > { %1910 = vmatprep.mubr.bf16.mxu1 %v544_v24  ;;  %1955 = vmatpush3.bf16.xpose.msra.mxu0 %v546_v38 }
 0x192   : > { %1962 = vmatprep.mubr.bf16.mxu0 %v546_v38 }
 0x193   : > { %v513_v40 = vpop.f32.mrb[20].mxu0 }
 0x194   : > { %v2691_v41 = vpop.f32.mrb[21].mxu0 }
 0x195   : > { %v517_v44 = vpop.f32.mrb[22].mxu0 }
 0x196   : > { %v547_v45 = vpack.c.bf16 %v517_v44, %v513_v40  ;;  %v2693_v46 = vpop.f32.mrb[23].mxu0 }
 0x198   : > { %1911 = vmatmul.mubr.bf16.gmra.mrb[4].mxu1 %v545_v31  ;;  %1956 = vmatprep.subr.bf16.mxu0 %v547_v45 }
 0x199   : > { %1957 = vmatpush3.bf16.xpose.msra.mxu0 %v547_v45 }
 0x19b   : > { %v523_v47 = vpop.f32.mrb[24].mxu0 }
 0x19c   : > { %v2695_v48 = vpop.f32.mrb[25].mxu0 }
 0x19d   : > { %v527_v49 = vpop.f32.mrb[26].mxu0 }
 0x19e   : > { %v548_v50 = vpack.c.bf16 %v527_v49, %v523_v47  ;;  %v2697_v51 = vpop.f32.mrb[27].mxu0 }
 0x1a0   : > { %1958 = vmatprep.subr.bf16.mxu0 %v548_v50 }
 0x1a1   : > { %1959 = vmatpush3.bf16.xpose.msra.mxu0 %v548_v50 }
 0x1a3   : > { %v533_v52 = vpop.f32.mrb[28].mxu0 }
 0x1a4   : > { %v2699_v53 = vpop.f32.mrb[29].mxu0 }
 0x1a5   : > { %v537_v54 = vpop.f32.mrb[30].mxu0 }
 0x1a6   : > { %v549_v55 = vpack.c.bf16 %v537_v54, %v533_v52  ;;  %v2701_v56 = vpop.f32.mrb[31].mxu0 }
 0x1a8   : > { %1960 = vmatprep.subr.bf16.mxu0 %v549_v55 }
 0x1a9   : > { %1961 = vmatpush3.bf16.xpose.msra.mxu0 %v549_v55 }
 0x1b0   : > { %1963 = vmatmul.mubr.bf16.vlgmr.msra.gmra.mrb[32].mxu0 %v547_v45 }
 0x1b1   : > { %1966 = vmatprep.mubr.bf16.mxu0 %v548_v50 }
 0x1b8   : > { %1967 = vmatmul.mubr.bf16.gmra.mrb[36].mxu0 %v549_v55 }
 0x263   : > { %v1908_v57 = vpop.f32.mrb[0].mxu1 }
 0x264   : > { %v607_v58 = vpop.f32.mrb[1].mxu1  ;;  %v641_v62 = vsel %vm638_vm0, %v1908_v57, -inf }
 0x265   : > { %v1909_v59 = vpop.f32.mrb[2].mxu1  ;;  %v639_v2 = vsel %vm638_vm0, %v607_v58, -inf }
 0x266   : > { %v610_v60 = vpop.f32.mrb[3].mxu1  ;;  %v642_v6 = vsel %vm638_vm0, %v1909_v59, -inf }
 0x267   : > { %v640_v10 = vsel %vm638_vm0, %v610_v60, -inf }
 0x26b   : > { %v1912_v61 = vpop.f32.mrb[4].mxu1 }
 0x26c   : > { %v647_v63 = vsel %vm638_vm0, %v1912_v61, -inf  ;;  %v623_v1 = vpop.f32.mrb[5].mxu1 }
 0x26d   : > { %v648_v3 = vmax.f32 %v641_v62, %v647_v63  ;;  %v643_v4 = vsel %vm638_vm0, %v623_v1, -inf  ;;  %v1913_v5 = vpop.f32.mrb[6].mxu1 }
 0x26e   : > { %v644_v7 = vmax.f32 %v639_v2, %v643_v4  ;;  %v649_v8 = vsel %vm638_vm0, %v1913_v5, -inf  ;;  %v626_v9 = vpop.f32.mrb[7].mxu1 }
 0x26f   : > { %v650_v12 = vmax.f32 %v642_v6, %v649_v8  ;;  %v645_v13 = vsel %vm638_vm0, %v626_v9, -inf }
 0x270   : > { %v646_v15 = vmax.f32 %v640_v10, %v645_v13 }
 0x271   : > { %v652_v17 = vmax.f32 %v648_v3, %v650_v12 }
 0x272   : > { %v651_v18 = vmax.f32 %v644_v7, %v646_v15 }
 0x274   : > { %v653_v0 = vmax.f32 %v651_v18, %v652_v17 }
 0x276   : > { %v654_v23 = vrot.slane %v653_v0, 4 }
 0x278   : > { %v655_v24 = vmax.f32 %v653_v0, %v654_v23 }
 0x27a   : > { %v656_v26 = vrot.slane %v655_v24, 2 }
 0x27c   : > { %v657_v30 = vmax.f32 %v655_v24, %v656_v26 }
 0x27e   : > { %v658_v31 = vrot.slane %v657_v30, 1 }
 0x280   : > { %v659_v33 = vmax.f32 %v657_v30, %v658_v31 }
 0x282   : > { %v660_v37 = vsub.f32 %v607_v58, %v659_v33  ;;  %v661_v38 = vsub.f32 %v610_v60, %v659_v33  ;;  %v662_v40 = vsub.f32 %v1908_v57, %v659_v33  ;;  %v663_v44 = vsub.f32 %v1909_v59, %v659_v33 }
 0x283   : > { %v664_v45 = vsub.f32 %v623_v1, %v659_v33  ;;  %v665_v47 = vsub.f32 %v626_v9, %v659_v33  ;;  %v666_v49 = vsub.f32 %v1912_v61, %v659_v33  ;;  %v667_v50 = vsub.f32 %v1913_v5, %v659_v33  ;;  %v2711_v52 = vpop.f32.mrb[32].mxu0 }
 0x284   : > { %v668_v54 = vpack.c.bf16 %v661_v38, %v660_v37  ;;  %v669_v55 = vpack.c.bf16 %v663_v44, %v662_v40  ;;  %v2713_v62 = vpop.f32.mrb[33].mxu0  ;;  %v1172_v60 = vsel %vm638_vm0, %v2711_v52, -inf }
 0x285   : > { %v670_v63 = vpack.c.bf16 %v665_v47, %v664_v45  ;;  %v671_v2 = vpack.c.bf16 %v667_v50, %v666_v49  ;;  %v2715_v3 = vpop.f32.mrb[34].mxu0  ;;  %v1170_v61 = vsel %vm638_vm0, %v2713_v62, -inf }
 0x286   : > { %v673_v4 = vmul.bf16 1069105081, %v668_v54  ;;  %v676_v6 = vmul.bf16 1069105081, %v669_v55  ;;  %v2717_v58 = vpop.f32.mrb[35].mxu0  ;;  %v1173_v5 = vsel %vm638_vm0, %v2715_v3, -inf }
 0x287   : > { %v679_v57 = vmul.bf16 1069105081, %v670_v63  ;;  %v682_v59 = vmul.bf16 1069105081, %v671_v2  ;;  %v1171_v9 = vsel %vm638_vm0, %v2717_v58, -inf }
 0x288   : > { %2135 = vpow.bf16 %v673_v4 }
 0x289   : > { %2137 = vpow.bf16 %v676_v6 }
 0x28a   : > { %2139 = vpow.bf16 %v679_v57 }
 0x28b   : > { %v2723_v1 = vpop.f32.mrb[36].mxu0  ;;  %2141 = vpow.bf16 %v682_v59 }
 0x28c   : > { %v1178_v7 = vsel %vm638_vm0, %v2723_v1, -inf  ;;  %v1155_v8 = vpop.f32.mrb[37].mxu0 }
 0x28d   : > { %v1179_v10 = vmax.f32 %v1172_v60, %v1178_v7  ;;  %v1174_v12 = vsel %vm638_vm0, %v1155_v8, -inf  ;;  %v1969_v13 = vpop.f32.mrb[38].mxu0 }
 0x28e   : > { %v1175_v15 = vmax.f32 %v1170_v61, %v1174_v12  ;;  %v1180_v17 = vsel %vm638_vm0, %v1969_v13, -inf  ;;  %v1158_v18 = vpop.f32.mrb[39].mxu0 }
 0x28f   : > { %v1181_v0 = vmax.f32 %v1173_v5, %v1180_v17  ;;  %v1176_v23 = vsel %vm638_vm0, %v1158_v18, -inf }
 0x290   : > { %v1177_v24 = vmax.f32 %v1171_v9, %v1176_v23 }
 0x291   : > { %v1183_v26 = vmax.f32 %v1179_v10, %v1181_v0 }
 0x292   : > { %v1182_v30 = vmax.f32 %v1175_v15, %v1177_v24 }
 0x293   : > { %v2136_v31 = vpop.eup %2135 }
 0x294   : > { %v2734_v33 = vpop.eup %2137  ;;  %v684_v37 = vunpack.c.l.bf16 %v2136_v31  ;;  %v685_v38 = vunpack.c.h.bf16 %v2136_v31  ;;  %v1184_v40 = vmax.f32 %v1182_v30, %v1183_v26  ;;  %1922 = vmatprep.mubr.msk.bf16.mxu1 %vm638_vm0, %v2136_v31 }
 0x295   : > { %v2737_v44 = vpop.eup %2139  ;;  %v686_v45 = vunpack.c.l.bf16 %v2734_v33  ;;  %v687_v47 = vunpack.c.h.bf16 %v2734_v33 }
 0x296   : > { %v692_v49 = vsel %vm638_vm0, %v684_v37, 0.0  ;;  %v693_v50 = vsel %vm638_vm0, %v685_v38, 0.0  ;;  %v688_v55 = vunpack.c.l.bf16 %v2737_v44  ;;  %v1185_v2 = vrot.slane %v1184_v40, 4  ;;  %v2745_v4 = vpop.eup %2141 }
 0x297   : > { %v694_v54 = vadd.f32 %v693_v50, %v692_v49  ;;  %v695_v63 = vsel %vm638_vm0, %v686_v45, 0.0  ;;  %v689_v57 = vunpack.c.h.bf16 %v2737_v44  ;;  %v697_v59 = vsel %vm638_vm0, %v687_v47, 0.0 }
 0x298   : > { %v1186_v60 = vmax.f32 %v1184_v40, %v1185_v2  ;;  %v690_v5 = vunpack.c.l.bf16 %v2745_v4  ;;  %v699_v7 = vsel %vm638_vm0, %v688_v55, 0.0  ;;  %v691_v12 = vunpack.c.h.bf16 %v2745_v4 }
 0x299   : > { %v696_v6 = vadd.f32 %v695_v63, %v694_v54  ;;  %v701_v15 = vsel %vm638_vm0, %v689_v57, 0.0 }
 0x29a   : > { %v1187_v9 = vrot.slane %v1186_v60, 2  ;;  %v703_v23 = vsel %vm638_vm0, %v690_v5, 0.0  ;;  %v705_v30 = vsel %vm638_vm0, %v691_v12, 0.0 }
 0x29b   : > { %v698_v61 = vadd.f32 %v697_v59, %v696_v6 }
 0x29c   : > { %v1188_v17 = vmax.f32 %v1186_v60, %v1187_v9 }
 0x29d   : > { %v700_v10 = vadd.f32 %v699_v7, %v698_v61 }
 0x29e   : > { %v1189_v24 = vrot.slane %v1188_v17, 1 }
 0x29f   : > { %v702_v0 = vadd.f32 %v701_v15, %v700_v10 }
 0x2a0   : > { %v1190_v31 = vmax.f32 %v1188_v17, %v1189_v24 }
 0x2a1   : > { %v704_v26 = vadd.f32 %v703_v23, %v702_v0 }
 0x2a2   : > { %v1191_v38 = vsub.f32 %v2713_v62, %v1190_v31  ;;  %v1192_v40 = vsub.f32 %v2717_v58, %v1190_v31  ;;  %v1193_v45 = vsub.f32 %v2711_v52, %v1190_v31  ;;  %v1194_v47 = vsub.f32 %v2715_v3, %v1190_v31 }
 0x2a3   : > { %v706_v37 = vadd.f32 %v705_v30, %v704_v26  ;;  %v1195_v50 = vsub.f32 %v1155_v8, %v1190_v31  ;;  %v1196_v54 = vsub.f32 %v1158_v18, %v1190_v31  ;;  %v1197_v55 = vsub.f32 %v2723_v1, %v1190_v31 }
 0x2a4   : > { %v1198_v63 = vsub.f32 %v1969_v13, %v1190_v31  ;;  %v1199_v2 = vpack.c.bf16 %v1192_v40, %v1191_v38  ;;  %v1200_v6 = vpack.c.bf16 %v1194_v47, %v1193_v45 }
 0x2a5   : > { %v707_v49 = vrot.slane %v706_v37, 4  ;;  %v1201_v59 = vpack.c.bf16 %v1196_v54, %v1195_v50 }
 0x2a6   : > { %v1202_v60 = vpack.c.bf16 %v1198_v63, %v1197_v55  ;;  %v1204_v61 = vmul.bf16 1069105081, %v1199_v2  ;;  %v1207_v5 = vmul.bf16 1069105081, %v1200_v6 }
 0x2a7   : > { %v708_v57 = vadd.f32 %v707_v49, %v706_v37  ;;  %v1210_v7 = vmul.bf16 1069105081, %v1201_v59 }
 0x2a8   : > { %2143 = vpow.bf16 %v1204_v61  ;;  %v1213_v58 = vmul.bf16 1069105081, %v1202_v60 }
 0x2a9   : > { %v709_v62 = vrot.slane %v708_v57, 2  ;;  %2145 = vpow.bf16 %v1207_v5 }
 0x2aa   : > { %2147 = vpow.bf16 %v1210_v7 }
 0x2ab   : > { %v710_v52 = vadd.f32 %v709_v62, %v708_v57  ;;  %2149 = vpow.bf16 %v1213_v58 }
 0x2ad   : > { %v711_v3 = vrot.slane %v710_v52, 1 }
 0x2af   : > { %v712_v8 = vadd.f32 %v711_v3, %v710_v52  ;;  %v550_v3 = vlaneseq }
 0x2b1   : > { %2151 = vrcp.f32 %v712_v8  ;;  %v2790_v8 = vshrl.u32 %v550_v3, 7 }
 0x2b3   : > { %v2760_v1 = vpop.eup %2143 }
 0x2b4   : > { %v2762_v13 = vpop.eup %2145  ;;  %v1215_v18 = vunpack.c.l.bf16 %v2760_v1  ;;  %v1216_v9 = vunpack.c.h.bf16 %v2760_v1 }
 0x2b5   : > { %v2766_v10 = vpop.eup %2147  ;;  %v1217_v12 = vunpack.c.l.bf16 %v2762_v13  ;;  %v1218_v15 = vunpack.c.h.bf16 %v2762_v13 }
 0x2b6   : > { %v1219_v17 = vunpack.c.l.bf16 %v2766_v10  ;;  %v1223_v0 = vsel %vm638_vm0, %v1215_v18, 0.0  ;;  %v1224_v23 = vsel %vm638_vm0, %v1216_v9, 0.0  ;;  %v2773_v24 = vpop.eup %2149  ;;  %v1220_v31 = vunpack.c.h.bf16 %v2766_v10  ;;  %v2796_v9 = vld [vmem:[%s3151_s3] sm:$0x7] }
 0x2b7   : > { %v1225_v26 = vadd.f32 %v1224_v23, %v1223_v0  ;;  %v1226_v30 = vsel %vm638_vm0, %v1217_v12, 0.0  ;;  %v1228_v37 = vsel %vm638_vm0, %v1218_v15, 0.0  ;;  %v1221_v45 = vunpack.c.l.bf16 %v2773_v24 }
 0x2b8   : > { %v1230_v47 = vsel %vm638_vm0, %v1219_v17, 0.0  ;;  %v1222_v50 = vunpack.c.h.bf16 %v2773_v24  ;;  %v1232_v54 = vsel %vm638_vm0, %v1220_v31, 0.0  ;;  %v552_v18 = vsub.s32 0, %v2790_v8 }
 0x2b9   : > { %v1227_v40 = vadd.f32 %v1226_v30, %v1225_v26  ;;  %v1234_v63 = vsel %vm638_vm0, %v1221_v45, 0.0  ;;  %v2801_v15 = vand.u32 127, %v550_v3 }
 0x2ba   : > { %v1236_v6 = vsel %vm638_vm0, %v1222_v50, 0.0  ;;  %v2799_v12 = vrot.slane %v2796_v9, %v552_v18 }
 0x2bb   : > { %v2152_v38 = vpop.eup %2151  ;;  %v1229_v49 = vadd.f32 %v1228_v37, %v1227_v40  ;;  %vm572_vm1 = vcmp.eq.s32.totalorder %v2801_v15, 32  ;;  %v2133_v15 = vld [vmem:[#allocation7 + $0x98] ss:$12 sps:$4 sm:$0xff]  }
 0x2bc   : > { %723 = vbcast.lane.b32.xlu1 %v2152_v38, 272  ;;  %715 = vbcast.lane.b32.xlu0 %v2152_v38, 256  ;;  %v554_v23 = vadd.f32 %v2799_v12, %v2671_v11  ;;  %v556_v26 = vadd.f32 %v2799_v12, %v2675_v16  ;;  %v555_v30 = vadd.f32 %v2799_v12, %v2673_v14 }
 0x2bd   : > { %v1231_v55 = vadd.f32 %v1230_v47, %v1229_v49  ;;  %v557_v31 = vadd.f32 %v2799_v12, %v2677_v19  ;;  %v558_v11 = vadd.f32 %v2799_v12, %v2679_v20  ;;  %v559_v16 = vadd.f32 %v2799_v12, %v2681_v25 }
 0x2be   : > { %v560_v25 = vadd.f32 %v2799_v12, %v2683_v27 }
 0x2bf   : > { %v1233_v2 = vadd.f32 %v1232_v54, %v1231_v55 }
 0x2c0   : > { %727 = vbcast.lane.b32.xlu1 %v2152_v38, 280  ;;  %719 = vbcast.lane.b32.xlu0 %v2152_v38, 264 }
 0x2c1   : > { %v1235_v57 = vadd.f32 %v1234_v63, %v1233_v2 }
 0x2c3   : > { %v1237_v59 = vadd.f32 %v1236_v6, %v1235_v57 }
 0x2c4   : > { %735 = vbcast.lane.b32.xlu1 %v2152_v38, 296  ;;  %731 = vbcast.lane.b32.xlu0 %v2152_v38, 288 }
 0x2c5   : > { %v1238_v60 = vrot.slane %v1237_v59, 4 }
 0x2c7   : > { %v1239_v61 = vadd.f32 %v1238_v60, %v1237_v59  ;;  %v561_v59 = vadd.f32 %v2799_v12, %v2685_v32 }
 0x2c8   : > { %743 = vbcast.lane.b32.xlu1 %v2152_v38, 312  ;;  %739 = vbcast.lane.b32.xlu0 %v2152_v38, 304 }
 0x2c9   : > { %v1240_v5 = vrot.slane %v1239_v61, 2 }
 0x2cb   : > { %v1241_v62 = vadd.f32 %v1240_v5, %v1239_v61 }
 0x2cd   : > { %v1242_v7 = vrot.slane %v1241_v62, 1 }
 0x2cf   : > { %v1243_v58 = vadd.f32 %v1242_v7, %v1241_v62 }
 0x2d1   : > { %2153 = vrcp.f32 %v1243_v58 }
 0x2db   : > { %v2784_v52 = vpop.eup %2153 }
 0x2dc   : > { %1250 = vbcast.lane.b32.xlu0 %v2784_v52, 264  ;;  %1246 = vbcast.lane.b32.xlu1 %v2784_v52, 256 }
 0x2e0   : > { %1254 = vbcast.lane.b32.xlu1 %v2784_v52, 272 }
 0x2e4   : > { %1258 = vbcast.lane.b32.xlu1 %v2784_v52, 280 }
 0x32e   : > { %v724_v17 = vpop.permute.xlu1 %723  ;;  %v716_v0 = vpop.permute.xlu0 %715 }
 0x32f   : > { %v747_v37 = vmul.f32 %v724_v17, %v556_v26  ;;  %v745_v38 = vmul.f32 %v716_v0, %v554_v23  ;;  %v2121_v23 = vld [vmem:[#allocation7 + $0x38] ss:$12 sps:$4 sm:$0xff]   ;;  %v2122_v26 = vld [vmem:[#allocation7 + $0x50] ss:$12 sps:$4 sm:$0xff]  }
 0x331   : > { %v757_v14 = vsel %vm572_vm1, %v724_v17, %v747_v37  ;;  %v755_v19 = vsel %vm572_vm1, %v716_v0, %v745_v38  ;;  %v2119_v17 = vld [vmem:[#allocation7 + $0x8] ss:$12 sps:$4 sm:$0xff]   ;;  %v2120_v0 = vld [vmem:[#allocation7 + $0x20] ss:$12 sps:$4 sm:$0xff]  }
 0x332   : > { %v728_v40 = vpop.permute.xlu1 %727  ;;  %v720_v45 = vpop.permute.xlu0 %719 }
 0x333   : > { %v748_v47 = vmul.f32 %v728_v40, %v557_v31  ;;  %v746_v49 = vmul.f32 %v720_v45, %v555_v30  ;;  %v562_v30 = vadd.f32 %v2799_v12, %v2687_v34  ;;  %v563_v31 = vadd.f32 %v2799_v12, %v2689_v39 }
 0x334   : > { %v564_v39 = vadd.f32 %v2799_v12, %v2691_v41  ;;  %v2126_v41 = vld [vmem:[#allocation7 + $0xb0] ss:$12 sps:$4 sm:$0xff]  }
 0x335   : > { %v758_v50 = vsel %vm572_vm1, %v728_v40, %v748_v47  ;;  %v756_v54 = vsel %vm572_vm1, %v720_v45, %v746_v49 }
 0x336   : > { %v764_v55 = vpack.c.bf16 %v758_v50, %v757_v14  ;;  %v763_v63 = vpack.c.bf16 %v756_v54, %v755_v19  ;;  %v736_v2 = vpop.permute.xlu1 %735  ;;  %v732_v6 = vpop.permute.xlu0 %731  ;;  %v2125_v50 = vld [vmem:[#allocation7 + $0x98] ss:$12 sps:$4 sm:$0xff]  }
 0x337   : > { %v750_v20 = vmul.f32 %v736_v2, %v559_v16  ;;  %v749_v57 = vmul.f32 %v732_v6, %v558_v11  ;;  %v565_v11 = vadd.f32 %v2799_v12, %v2693_v46 }
 0x338   : > { %1914 = vmatprep.subr.bf16.mxu1 %v763_v63 }
 0x339   : > { %v760_v60 = vsel %vm572_vm1, %v736_v2, %v750_v20  ;;  %v759_v61 = vsel %vm572_vm1, %v732_v6, %v749_v57  ;;  %1915 = vmatpush3.bf16.msra.mxu1 %v763_v63 }
 0x33a   : > { %v765_v5 = vpack.c.bf16 %v760_v60, %v759_v61  ;;  %v744_v62 = vpop.permute.xlu1 %743  ;;  %v740_v7 = vpop.permute.xlu0 %739  ;;  %1916 = vmatprep.subr.bf16.mxu1 %v764_v55 }
 0x33b   : > { %v752_v58 = vmul.f32 %v744_v62, %v561_v59  ;;  %v751_v3 = vmul.f32 %v740_v7, %v560_v25 }
 0x33d   : > { %v762_v18 = vsel %vm572_vm1, %v744_v62, %v752_v58  ;;  %v761_v27 = vsel %vm572_vm1, %v740_v7, %v751_v3  ;;  %1917 = vmatpush3.bf16.msra.mxu1 %v764_v55 }
 0x33e   : > { %v766_v32 = vpack.c.bf16 %v762_v18, %v761_v27  ;;  %1918 = vmatprep.subr.bf16.mxu1 %v765_v5 }
 0x341   : > { %1919 = vmatpush3.bf16.msra.mxu1 %v765_v5 }
 0x342   : > { %1920 = vmatprep.subr.bf16.mxu1 %v766_v32 }
 0x345   : > { %1921 = vmatpush3.bf16.msra.mxu1 %v766_v32 }
 0x346   : > { %1930 = vmatprep.subr.bf16.mxu1 %v2119_v17 }
 0x348   : > { %1923 = vmatmul.mubr.msk.bf16.vlgmr.msra.gmra.mrb[8].mxu1 %vm638_vm0, %v2734_v33 }
 0x349   : > { %1926 = vmatprep.mubr.msk.bf16.mxu1 %vm638_vm0, %v2737_v44  ;;  %1931 = vmatpush3.bf16.msra.mxu1 %v2119_v17  ;;  %v2123_v44 = vld [vmem:[#allocation7 + $0x68] ss:$12 sps:$4 sm:$0xff]  }
 0x34a   : > { %1932 = vmatprep.subr.bf16.mxu1 %v2120_v0 }
 0x34d   : > { %1933 = vmatpush3.bf16.msra.mxu1 %v2120_v0 }
 0x34e   : > { %1934 = vmatprep.subr.bf16.mxu1 %v2121_v23  ;;  %v1251_v37 = vpop.permute.xlu0 %1250  ;;  %v1247_v38 = vpop.permute.xlu1 %1246 }
 0x34f   : > { %v1277_v33 = vmul.f32 %v1251_v37, %v563_v31  ;;  %v1276_v40 = vmul.f32 %v1247_v38, %v562_v30 }
 0x350   : > { %1927 = vmatmul.mubr.msk.bf16.gmra.mrb[12].mxu1 %vm638_vm0, %v2745_v4  ;;  %v2124_v4 = vld [vmem:[#allocation7 + $0x80] ss:$12 sps:$4 sm:$0xff]  }
 0x351   : > { %1935 = vmatpush3.bf16.msra.mxu1 %v2121_v23  ;;  %v1285_v45 = vsel %vm572_vm1, %v1251_v37, %v1277_v33  ;;  %v1284_v47 = vsel %vm572_vm1, %v1247_v38, %v1276_v40 }
 0x352   : > { %1936 = vmatprep.subr.bf16.mxu1 %v2122_v26  ;;  %v2850_v34 = vpack.c.bf16 %v1285_v45, %v1284_v47  ;;  %v1255_v49 = vpop.permute.xlu1 %1254 }
 0x353   : > { %v1278_v16 = vmul.f32 %v1255_v49, %v564_v39 }
 0x355   : > { %1937 = vmatpush3.bf16.msra.mxu1 %v2122_v26  ;;  %v1286_v54 = vsel %vm572_vm1, %v1255_v49, %v1278_v16  ;;  %v567_v16 = vadd.f32 %v2799_v12, %v2697_v51 }
 0x356   : > { %1938 = vmatprep.subr.bf16.mxu1 %v2123_v44  ;;  %v1259_v14 = vpop.permute.xlu1 %1258 }
 0x357   : > { %v1279_v19 = vmul.f32 %v1259_v14, %v565_v11 }
 0x359   : > { %1939 = vmatpush3.bf16.msra.mxu1 %v2123_v44  ;;  %v1287_v55 = vsel %vm572_vm1, %v1259_v14, %v1279_v19 }
 0x35a   : > { %1940 = vmatprep.subr.bf16.mxu1 %v2124_v4  ;;  %v2860_v63 = vpack.c.bf16 %v1287_v55, %v1286_v54  ;;  %v566_v54 = vadd.f32 %v2799_v12, %v2695_v48  ;;  %v568_v48 = vadd.f32 %v2799_v12, %v2699_v53 }
 0x35d   : > { %1941 = vmatpush3.bf16.msra.mxu1 %v2124_v4 }
 0x35e   : > { %1942 = vmatprep.subr.bf16.mxu1 %v2125_v50 }
 0x361   : > { %1943 = vmatpush3.bf16.msra.mxu1 %v2125_v50 }
 0x362   : > { %1944 = vmatprep.subr.bf16.mxu1 %v2126_v41 }
 0x365   : > { %1945 = vmatpush3.bf16.msra.mxu1 %v2126_v41 }
 0x366   : > { %1970 = vmatprep.subr.bf16.mxu1 %v2850_v34 }
 0x41b   : > { %v1924_v46 = vpop.f32.mrb[8].mxu1 }
 0x41c   : > { %v813_v2 = vpop.f32.mrb[9].mxu1  ;;  %v846_v6 = vsel %vm572_vm1, %v1924_v46, 0.0 }
 0x41d   : > { %856 = vadd.xlane.f32.xlu0 %v846_v6  ;;  %v2865_v20 = vpop.f32.mrb[10].mxu1  ;;  %v844_v59 = vsel %vm572_vm1, %v813_v2, 0.0 }
 0x41e   : > { %v816_v57 = vpop.f32.mrb[11].mxu1  ;;  %v847_v5 = vsel %vm572_vm1, %v2865_v20, 0.0 }
 0x41f   : > { %v845_v25 = vsel %vm572_vm1, %v816_v57, 0.0 }
 0x420   : > { %854 = vadd.xlane.f32.xlu1 %v845_v25 }
 0x421   : > { %852 = vadd.xlane.f32.xlu0 %v844_v59 }
 0x423   : > { %v2871_v60 = vpop.f32.mrb[12].mxu1 }
 0x424   : > { %v2873_v61 = vpop.f32.mrb[13].mxu1  ;;  %v850_v62 = vsel %vm572_vm1, %v2871_v60, 0.0 }
 0x425   : > { %858 = vadd.xlane.f32.xlu0 %v847_v5  ;;  %864 = vadd.xlane.f32.xlu1 %v850_v62  ;;  %v2881_v7 = vpop.f32.mrb[14].mxu1  ;;  %v848_v3 = vsel %vm572_vm1, %v2873_v61, 0.0 }
 0x426   : > { %v2883_v58 = vpop.f32.mrb[15].mxu1  ;;  %v851_v18 = vsel %vm572_vm1, %v2881_v7, 0.0 }
 0x427   : > { %v849_v27 = vsel %vm572_vm1, %v2883_v58, 0.0 }
 0x429   : > { %860 = vadd.xlane.f32.xlu1 %v848_v3  ;;  %866 = vadd.xlane.f32.xlu0 %v851_v18  ;;  %v569_v3 = vadd.f32 %v2799_v12, %v2701_v56 }
 0x42d   : > { %862 = vadd.xlane.f32.xlu0 %v849_v27 }
 0x43a   : > { %1266 = vbcast.lane.b32.xlu1 %v2784_v52, 296 }
 0x43e   : > { %1274 = vbcast.lane.b32.xlu1 %v2784_v52, 312 }
 0x443   : > { %1262 = vbcast.lane.b32.xlu0 %v2784_v52, 288 }
 0x447   : > { %1270 = vbcast.lane.b32.xlu0 %v2784_v52, 304 }
 0x4aa   : > { %v857_v32 = vpop.xlane.xlu0 %856 }
 0x4ab   : > { %v870_v17 = vadd.f32 1e-09, %v857_v32 }
 0x4ad   : > { %v855_v0 = vpop.xlane.xlu1 %854  ;;  %2155 = vrcp.f32 %v870_v17 }
 0x4ae   : > { %v869_v23 = vadd.f32 1e-09, %v855_v0  ;;  %v853_v26 = vpop.xlane.xlu0 %852 }
 0x4af   : > { %v868_v30 = vadd.f32 1e-09, %v853_v26 }
 0x4b0   : > { %2157 = vrcp.f32 %v869_v23 }
 0x4b1   : > { %2159 = vrcp.f32 %v868_v30 }
 0x4b2   : > { %v859_v31 = vpop.xlane.xlu0 %858  ;;  %v865_v37 = vpop.xlane.xlu1 %864 }
 0x4b3   : > { %v871_v38 = vadd.f32 1e-09, %v859_v31  ;;  %v874_v33 = vadd.f32 1e-09, %v865_v37 }
 0x4b5   : > { %2161 = vrcp.f32 %v871_v38 }
 0x4b6   : > { %2163 = vrcp.f32 %v874_v33  ;;  %v861_v40 = vpop.xlane.xlu1 %860  ;;  %v867_v44 = vpop.xlane.xlu0 %866 }
 0x4b7   : > { %v872_v45 = vadd.f32 1e-09, %v861_v40  ;;  %v875_v47 = vadd.f32 1e-09, %v867_v44  ;;  %v2156_v52 = vpop.eup %2155 }
 0x4b8   : > { %v886_v6 = vmul.f32 %v2156_v52, %v1924_v46 }
 0x4b9   : > { %2165 = vrcp.f32 %v872_v45 }
 0x4ba   : > { %v2158_v49 = vpop.eup %2157  ;;  %2167 = vrcp.f32 %v875_v47  ;;  %v1267_v39 = vpop.permute.xlu1 %1266  ;;  %v918_v56 = vsub.f32 %v2622_v28, %v886_v6 }
 0x4bb   : > { %v863_v4 = vpop.xlane.xlu0 %862  ;;  %v2160_v11 = vpop.eup %2159  ;;  %v885_v19 = vmul.f32 %v2158_v49, %v816_v57  ;;  %v1281_v55 = vmul.f32 %v1267_v39, %v567_v16  ;;  %v2187_v16 = vld [vmem:[%s2589_s6 + $0x10] sm:$0xff] }
 0x4bc   : > { %v873_v14 = vadd.f32 1e-09, %v863_v4  ;;  %v884_v50 = vmul.f32 %v2160_v11, %v813_v2 }
 0x4bd   : > { %v917_v41 = vsub.f32 %v2614_v22, %v885_v19  ;;  %v1289_v22 = vsel %vm572_vm1, %v1267_v39, %v1281_v55 }
 0x4be   : > { %2169 = vrcp.f32 %v873_v14  ;;  %v1275_v25 = vpop.permute.xlu1 %1274  ;;  %v916_v5 = vsub.f32 %v2612_v21, %v884_v50  ;;  %v2188_v50 = vld [vmem:[%s2589_s6] sm:$0xff] }
 0x4bf   : > { %v1263_v59 = vpop.permute.xlu0 %1262  ;;  %v2162_v62 = vpop.eup %2161  ;;  %v1283_v46 = vmul.f32 %v1275_v25, %v569_v3 }
 0x4c0   : > { %v1280_v51 = vmul.f32 %v1263_v59, %v566_v54  ;;  %v2164_v18 = vpop.eup %2163  ;;  %v887_v2 = vmul.f32 %v2162_v62, %v2865_v20  ;;  %v924_v57 = vpack.c.bf16 %v917_v41, %v916_v5  ;;  %v2189_v41 = vld [vmem:[%s2589_s6 + $0x18] sm:$0xff] }
 0x4c1   : > { %v890_v23 = vmul.f32 %v2164_v18, %v2871_v60  ;;  %v1291_v12 = vsel %vm572_vm1, %v1275_v25, %v1283_v46  ;;  %v2190_v25 = vld [vmem:[%s2589_s6 + $0x8] sm:$0xff] }
 0x4c2   : > { %v1288_v27 = vsel %vm572_vm1, %v1263_v59, %v1280_v51  ;;  %1946 = vmatprep.mubr.bf16.mxu1 %v924_v57  ;;  %v919_v17 = vsub.f32 %v2624_v29, %v887_v2 }
 0x4c3   : > { %v1294_v21 = vpack.c.bf16 %v1289_v22, %v1288_v27  ;;  %v1271_v32 = vpop.permute.xlu0 %1270  ;;  %v2166_v0 = vpop.eup %2165  ;;  %v922_v29 = vsub.f32 %v2644_v42, %v890_v23  ;;  %v1059_v42 = vsub.s32 1, %v2790_v8  ;;  %v2192_v23 = vld [vmem:[%s2589_s6 + $0x20] sm:$0xff] }
 0x4c4   : > { %v1282_v20 = vmul.f32 %v1271_v32, %v568_v48  ;;  %v2168_v26 = vpop.eup %2167  ;;  %v925_v53 = vpack.c.bf16 %v919_v17, %v918_v56  ;;  %v888_v28 = vmul.f32 %v2166_v0, %v2873_v61  ;;  %v2191_v17 = vld [vmem:[%s2589_s6 + $0x30] sm:$0xff] }
 0x4c5   : > { %v891_v31 = vmul.f32 %v2168_v26, %v2881_v7 }
 0x4c6   : > { %v1290_v30 = vsel %vm572_vm1, %v1271_v32, %v1282_v20  ;;  %1947 = vmatmul.mubr.bf16.vlgmr.msra.gmra.mrb[16].mxu1 %v925_v53  ;;  %v920_v44 = vsub.f32 %v2633_v35, %v888_v28  ;;  %v2127_v35 = vld [vmem:[#allocation7 + $0x8] ss:$12 sps:$4 sm:$0xff]  }
 0x4c7   : > { %v1295_v37 = vpack.c.bf16 %v1291_v12, %v1290_v30  ;;  %1971 = vmatpush3.bf16.msra.mxu1 %v2850_v34  ;;  %v923_v60 = vsub.f32 %v2646_v43, %v891_v31  ;;  %1986 = vmatprep.subr.bf16.mxu0 %v2127_v35  ;;  %v1071_v43 = vsub.s32 2, %v2790_v8  ;;  %v2193_v30 = vld [vmem:[%s2589_s6 + $0x38] sm:$0xff] }
 0x4c8   : > { %v2170_v38 = vpop.eup %2169  ;;  %1972 = vmatprep.subr.bf16.mxu1 %v2860_v63  ;;  %1987 = vmatpush3.bf16.msra.mxu0 %v2127_v35 }
 0x4c9   : > { %v889_v33 = vmul.f32 %v2170_v38, %v2883_v58  ;;  %v927_v40 = vpack.c.bf16 %v923_v60, %v922_v29  ;;  %v2194_v38 = vld [vmem:[%s2589_s6 + $0x28] sm:$0xff] }
 0x4cb   : > { %v921_v7 = vsub.f32 %v2635_v36, %v889_v33  ;;  %1973 = vmatpush3.bf16.msra.mxu1 %v2860_v63  ;;  %v2128_v36 = vld [vmem:[#allocation7 + $0x20] ss:$12 sps:$4 sm:$0xff]  }
 0x4cc   : > { %1974 = vmatprep.subr.bf16.mxu1 %v1294_v21  ;;  %1988 = vmatprep.subr.bf16.mxu0 %v2128_v36 }
 0x4cd   : > { %v926_v61 = vpack.c.bf16 %v921_v7, %v920_v44  ;;  %1989 = vmatpush3.bf16.msra.mxu0 %v2128_v36 }
 0x4cf   : > { %1950 = vmatprep.mubr.bf16.mxu1 %v926_v61  ;;  %1975 = vmatpush3.bf16.msra.mxu1 %v1294_v21 }
 0x4d0   : > { %1951 = vmatmul.mubr.bf16.gmra.mrb[20].mxu1 %v927_v40  ;;  %1976 = vmatprep.subr.bf16.mxu1 %v1295_v37 }
 0x4d1   : > { %1978 = vmatprep.mubr.msk.bf16.mxu1 %vm638_vm0, %v2760_v1  ;;  %v2941_v1 = vrot.slane %v2796_v9, %v1059_v42 }
 0x4d3   : > { %1977 = vmatpush3.bf16.msra.mxu1 %v1295_v37 }
 0x4d4   : > { %2010 = vmatprep.subr.bf16.mxu1 %v2127_v35 }
 0x4d8   : > { %1979 = vmatmul.mubr.msk.bf16.vlgmr.msra.gmra.mrb[24].mxu1 %vm638_vm0, %v2762_v13  ;;  %v2944_v13 = vrot.slane %v2796_v9, %v1071_v43 }
 0x4d9   : > { %1982 = vmatprep.mubr.msk.bf16.mxu1 %vm638_vm0, %v2766_v10  ;;  %2018 = vmatpush3.bf16.msra.mxu1 %v2127_v35 }
 0x4da   : > { %2011 = vmatprep.subr.bf16.mxu1 %v2128_v36 }
 0x4dd   : > { %2019 = vmatpush3.bf16.msra.mxu1 %v2128_v36 }
 0x4e0   : > { %1983 = vmatmul.mubr.msk.bf16.gmra.mrb[28].mxu1 %vm638_vm0, %v2773_v24 }
 0x599   : > { %v1948_v10 = vpop.f32.mrb[16].mxu1 }
 0x59a   : > { %v1063_v24 = vmul.f32 %v1948_v10, %v2941_v1  ;;  %v1026_v34 = vpop.f32.mrb[17].mxu1 }
 0x59b   : > { %v1061_v63 = vmul.f32 %v2941_v1, %v1026_v34  ;;  %v1949_v58 = vpop.f32.mrb[18].mxu1  ;;  %v2129_v34 = vld [vmem:[#allocation7 + $0x38] ss:$12 sps:$4 sm:$0xff]  }
 0x59c   : > { %v1075_v45 = vadd.f32 %v2944_v13, %v1063_v24  ;;  %v1064_v8 = vmul.f32 %v1949_v58, %v2941_v1  ;;  %v1029_v47 = vpop.f32.mrb[19].mxu1  ;;  %1990 = vmatprep.subr.bf16.mxu0 %v2129_v34  ;;  %2012 = vmatprep.subr.bf16.mxu1 %v2129_v34  ;;  %v2130_v58 = vld [vmem:[#allocation7 + $0x50] ss:$12 sps:$4 sm:$0xff]  }
 0x59d   : > { %v1073_v52 = vadd.f32 %v2944_v13, %v1061_v63  ;;  %v1062_v9 = vmul.f32 %v2941_v1, %v1029_v47  ;;  %1991 = vmatpush3.bf16.msra.mxu0 %v2129_v34  ;;  %2020 = vmatpush3.bf16.msra.mxu1 %v2129_v34  ;;  %v2134_v47 = vld [vmem:[#allocation7 + $0xb0] ss:$12 sps:$4 sm:$0xff]  }
 0x59e   : > { %v1083_v49 = vmax.f32 %v1075_v45, 0.0  ;;  %v1076_v39 = vadd.f32 %v2944_v13, %v1064_v8  ;;  %1992 = vmatprep.subr.bf16.mxu0 %v2130_v58  ;;  %2013 = vmatprep.subr.bf16.mxu1 %v2130_v58  ;;  %v2131_v45 = vld [vmem:[#allocation7 + $0x68] ss:$12 sps:$4 sm:$0xff]   ;;  %v2132_v8 = vld [vmem:[#allocation7 + $0x80] ss:$12 sps:$4 sm:$0xff]  }
 0x59f   : > { %v1081_v4 = vmax.f32 %v1073_v52, 0.0  ;;  %v1074_v11 = vadd.f32 %v2944_v13, %v1062_v9 }
 0x5a0   : > { %v1091_v14 = vadd.f32 %v2187_v16, %v1083_v49  ;;  %v1084_v19 = vmax.f32 %v1076_v39, 0.0 }
 0x5a1   : > { %v1089_v54 = vadd.f32 %v2188_v50, %v1081_v4  ;;  %v1082_v55 = vmax.f32 %v1074_v11, 0.0  ;;  %1993 = vmatpush3.bf16.msra.mxu0 %v2130_v58  ;;  %2021 = vmatpush3.bf16.msra.mxu1 %v2130_v58 }
 0x5a2   : > { %1099 = vst [vmem:[%s2957_s8 + $0x10] sm:$0xff] %v1091_v14  ;;  %v1092_v6 = vadd.f32 %v2189_v41, %v1084_v19  ;;  %1994 = vmatprep.subr.bf16.mxu0 %v2131_v45  ;;  %2014 = vmatprep.subr.bf16.mxu1 %v2131_v45  ;;  %v3022_v41 = vld [vmem:[%s2589_s6 + $0x40] sm:$0xff] }
 0x5a3   : > { %1097 = vst [vmem:[%s2957_s8] sm:$0xff] %v1089_v54  ;;  %v1090_v59 = vadd.f32 %v2190_v25, %v1082_v55  ;;  %v1952_v5 = vpop.f32.mrb[20].mxu1 }
 0x5a4   : > { %1100 = vst [vmem:[%s2957_s8 + $0x18] sm:$0xff] %v1092_v6  ;;  %v1067_v62 = vmul.f32 %v1952_v5, %v2941_v1  ;;  %v1042_v3 = vpop.f32.mrb[21].mxu1  ;;  %v3025_v6 = vld [vmem:[%s2589_s6 + $0x50] sm:$0xff]  ;;  %v3028_v5 = vld [vmem:[%s2589_s6 + $0x48] sm:$0xff] }
 0x5a5   : > { %1098 = vst [vmem:[%s2957_s8 + $0x8] sm:$0xff] %v1090_v59  ;;  %v1065_v51 = vmul.f32 %v2941_v1, %v1042_v3  ;;  %v1953_v18 = vpop.f32.mrb[22].mxu1  ;;  %1995 = vmatpush3.bf16.msra.mxu0 %v2131_v45  ;;  %2022 = vmatpush3.bf16.msra.mxu1 %v2131_v45  ;;  %v1807_v3 = vld [vmem:[%s2597_s13 + $0x48] sm:$0xff]  ;;  %v1805_v45 = vld [vmem:[%s2589_s6 + $0x78] sm:$0xff] }
 0x5a6   : > { %v1079_v2 = vadd.f32 %v2944_v13, %v1067_v62  ;;  %v1068_v57 = vmul.f32 %v1953_v18, %v2941_v1  ;;  %v1045_v48 = vpop.f32.mrb[23].mxu1  ;;  %1996 = vmatprep.subr.bf16.mxu0 %v2132_v8  ;;  %2015 = vmatprep.subr.bf16.mxu1 %v2132_v8  ;;  %v1806_v62 = vld [vmem:[%s2597_s13 + $0x40] sm:$0xff] }
 0x5a7   : > { %v1077_v22 = vadd.f32 %v2944_v13, %v1065_v51  ;;  %v1066_v46 = vmul.f32 %v2941_v1, %v1045_v48  ;;  %v1809_v48 = vld [vmem:[%s2597_s13 + $0x58] sm:$0xff] }
 0x5a8   : > { %v1087_v27 = vmax.f32 %v1079_v2, 0.0  ;;  %v1080_v21 = vadd.f32 %v2944_v13, %v1068_v57  ;;  %v3033_v2 = vld [vmem:[%s2589_s6 + $0x58] sm:$0xff]  ;;  %v1808_v57 = vld [vmem:[%s2597_s13 + $0x50] sm:$0xff] }
 0x5a9   : > { %v1085_v32 = vmax.f32 %v1077_v22, 0.0  ;;  %v1078_v56 = vadd.f32 %v2944_v13, %v1066_v46  ;;  %1997 = vmatpush3.bf16.msra.mxu0 %v2132_v8  ;;  %2023 = vmatpush3.bf16.msra.mxu1 %v2132_v8  ;;  %v1439_v46 = vadd.f32 %v1806_v62, %v3022_v41  ;;  %v1813_v8 = vld [vmem:[%s2597_s13 + $0x78] sm:$0xff] }
 0x5aa   : > { %v1095_v0 = vadd.f32 %v2191_v17, %v1087_v27  ;;  %v1088_v20 = vmax.f32 %v1080_v21, 0.0  ;;  %1998 = vmatprep.subr.bf16.mxu0 %v2133_v15  ;;  %2016 = vmatprep.subr.bf16.mxu1 %v2133_v15  ;;  %v1440_v27 = vadd.f32 %v1807_v3, %v3028_v5  ;;  %v1441_v17 = vadd.f32 %v1808_v57, %v3025_v6 }
 0x5ab   : > { %v1093_v26 = vadd.f32 %v2192_v23, %v1085_v32  ;;  %v1086_v53 = vmax.f32 %v1078_v56, 0.0  ;;  %v2975_v12 = vpop.f32.mrb[24].mxu1 }
 0x5ac   : > { %1103 = vst [vmem:[%s2957_s8 + $0x30] sm:$0xff] %v1095_v0  ;;  %v1096_v31 = vadd.f32 %v2193_v30, %v1088_v20  ;;  %v2979_v37 = vpop.f32.mrb[25].mxu1  ;;  %v1375_v28 = vsel %vm572_vm1, %v2975_v12, 0.0  ;;  %v1442_v0 = vadd.f32 %v1809_v48, %v3033_v2 }
 0x5ad   : > { %1101 = vst [vmem:[%s2957_s8 + $0x20] sm:$0xff] %v1093_v26  ;;  %v1094_v29 = vadd.f32 %v2194_v38, %v1086_v53  ;;  %1385 = vadd.xlane.f32.xlu1 %v1375_v28  ;;  %v2986_v60 = vpop.f32.mrb[26].mxu1  ;;  %v1373_v33 = vsel %vm572_vm1, %v2979_v37, 0.0  ;;  %1999 = vmatpush3.bf16.msra.mxu0 %v2133_v15  ;;  %v3046_v28 = vld [vmem:[%s2589_s6 + $0x60] sm:$0xff] }
 0x5ae   : > { %1104 = vst [vmem:[%s2957_s8 + $0x38] sm:$0xff] %v1096_v31  ;;  %1381 = vadd.xlane.f32.xlu0 %v1373_v33  ;;  %v2992_v40 = vpop.f32.mrb[27].mxu1  ;;  %v1376_v7 = vsel %vm572_vm1, %v2986_v60, 0.0  ;;  %2024 = vmatpush3.bf16.msra.mxu1 %v2133_v15  ;;  %v3049_v33 = vld [vmem:[%s2589_s6 + $0x68] sm:$0xff] }
 0x5af   : > { %1102 = vst [vmem:[%s2957_s8 + $0x28] sm:$0xff] %v1094_v29  ;;  %v1374_v44 = vsel %vm572_vm1, %v2992_v40, 0.0  ;;  %2000 = vmatprep.subr.bf16.mxu0 %v2134_v47  ;;  %2017 = vmatprep.subr.bf16.mxu1 %v2134_v47 }
 0x5b1   : > { %1383 = vadd.xlane.f32.xlu1 %v1374_v44  ;;  %2001 = vmatpush3.bf16.msra.mxu0 %v2134_v47  ;;  %v1810_v44 = vld [vmem:[%s2597_s13 + $0x60] sm:$0xff] }
 0x5b2   : > { %1387 = vadd.xlane.f32.xlu0 %v1376_v7  ;;  %2025 = vmatpush3.bf16.msra.mxu1 %v2134_v47  ;;  %v1811_v7 = vld [vmem:[%s2597_s13 + $0x68] sm:$0xff]  ;;  %v1443_v34 = vadd.f32 %v1810_v44, %v3046_v28 }
 0x5b3   : > { %v3001_v61 = vpop.f32.mrb[28].mxu1 }
 0x5b4   : > { %v3003_v35 = vpop.f32.mrb[29].mxu1  ;;  %v1379_v36 = vsel %vm572_vm1, %v3001_v61, 0.0 }
 0x5b5   : > { %1393 = vadd.xlane.f32.xlu1 %v1379_v36  ;;  %v3008_v42 = vpop.f32.mrb[30].mxu1  ;;  %v1377_v43 = vsel %vm572_vm1, %v3003_v35, 0.0 }
 0x5b6   : > { %1389 = vadd.xlane.f32.xlu0 %v1377_v43  ;;  %v3013_v10 = vpop.f32.mrb[31].mxu1  ;;  %v1380_v63 = vsel %vm572_vm1, %v3008_v42, 0.0  ;;  %v1812_v43 = vld [vmem:[%s2597_s13 + $0x70] sm:$0xff] }
 0x5b7   : > { %v1378_v24 = vsel %vm572_vm1, %v3013_v10, 0.0 }
 0x5ba   : > { %1391 = vadd.xlane.f32.xlu0 %v1378_v24 }
 0x5be   : > { %1395 = vadd.xlane.f32.xlu0 %v1380_v63  ;;  %v1444_v63 = vadd.f32 %v1811_v7, %v3049_v33 }
 0x63a   : > { %v1386_v52 = vpop.xlane.xlu1 %1385 }
 0x63b   : > { %v1399_v9 = vadd.f32 1e-09, %v1386_v52  ;;  %v1382_v49 = vpop.xlane.xlu0 %1381 }
 0x63c   : > { %v1397_v39 = vadd.f32 1e-09, %v1382_v49 }
 0x63d   : > { %2171 = vrcp.f32 %v1399_v9  ;;  %v1446_v9 = vadd.f32 %v1813_v8, %v1805_v45 }
 0x63e   : > { %2173 = vrcp.f32 %v1397_v39  ;;  %v1384_v4 = vpop.xlane.xlu1 %1383 }
 0x63f   : > { %v1398_v11 = vadd.f32 1e-09, %v1384_v4  ;;  %v1388_v16 = vpop.xlane.xlu0 %1387 }
 0x640   : > { %v1400_v14 = vadd.f32 1e-09, %v1388_v16 }
 0x641   : > { %2175 = vrcp.f32 %v1398_v11 }
 0x642   : > { %2177 = vrcp.f32 %v1400_v14  ;;  %v1394_v19 = vpop.xlane.xlu1 %1393 }
 0x643   : > { %v1390_v50 = vpop.xlane.xlu0 %1389  ;;  %v1403_v55 = vadd.f32 1e-09, %v1394_v19 }
 0x644   : > { %v1401_v54 = vadd.f32 1e-09, %v1390_v50 }
 0x646   : > { %2179 = vrcp.f32 %v1401_v54 }
 0x647   : > { %v2172_v25 = vpop.eup %2171  ;;  %v1392_v59 = vpop.xlane.xlu0 %1391  ;;  %2181 = vrcp.f32 %v1403_v55 }
 0x648   : > { %v2174_v51 = vpop.eup %2173  ;;  %v1402_v18 = vadd.f32 1e-09, %v1392_v59  ;;  %v1415_v32 = vmul.f32 %v2172_v25, %v2975_v12 }
 0x649   : > { %v1413_v22 = vmul.f32 %v2174_v51, %v2979_v37 }
 0x64a   : > { %2183 = vrcp.f32 %v1402_v18  ;;  %v1449_v12 = vsub.f32 %v1441_v17, %v1415_v32 }
 0x64b   : > { %v2176_v21 = vpop.eup %2175  ;;  %v1396_v56 = vpop.xlane.xlu0 %1395  ;;  %v1447_v30 = vsub.f32 %v1439_v46, %v1413_v22 }
 0x64c   : > { %v2178_v20 = vpop.eup %2177  ;;  %v1404_v23 = vadd.f32 1e-09, %v1396_v56  ;;  %v1414_v26 = vmul.f32 %v2176_v21, %v2992_v40 }
 0x64d   : > { %v1416_v53 = vmul.f32 %v2178_v20, %v2986_v60  ;;  %v3054_v60 = vld [vmem:[%s2589_s6 + $0x70] sm:$0xff] }
 0x64e   : > { %2185 = vrcp.f32 %v1404_v23  ;;  %v1448_v31 = vsub.f32 %v1440_v27, %v1414_v26  ;;  %v1445_v47 = vadd.f32 %v1812_v43, %v3054_v60 }
 0x64f   : > { %v1450_v37 = vsub.f32 %v1442_v0, %v1416_v53 }
 0x650   : > { %v2180_v38 = vpop.eup %2179  ;;  %v1455_v29 = vpack.c.bf16 %v1448_v31, %v1447_v30 }
 0x651   : > { %v1456_v40 = vpack.c.bf16 %v1450_v37, %v1449_v12  ;;  %v2182_v36 = vpop.eup %2181  ;;  %v1417_v24 = vmul.f32 %v2180_v38, %v3003_v35 }
 0x652   : > { %2002 = vmatprep.mubr.bf16.mxu0 %v1455_v29  ;;  %v1419_v52 = vmul.f32 %v2182_v36, %v3001_v61 }
 0x653   : > { %2003 = vmatmul.mubr.bf16.vlgmr.msra.gmra.mrb[40].mxu0 %v1456_v40  ;;  %v1451_v49 = vsub.f32 %v1443_v34, %v1417_v24 }
 0x654   : > { %v2184_v58 = vpop.eup %2183  ;;  %v1453_v16 = vsub.f32 %v1445_v47, %v1419_v52 }
 0x655   : > { %v1418_v15 = vmul.f32 %v2184_v58, %v3013_v10 }
 0x657   : > { %v1452_v39 = vsub.f32 %v1444_v63, %v1418_v15 }
 0x658   : > { %v2186_v4 = vpop.eup %2185 }
 0x659   : > { %v1420_v11 = vmul.f32 %v2186_v4, %v3008_v42  ;;  %v1457_v35 = vpack.c.bf16 %v1452_v39, %v1451_v49 }
 0x65b   : > { %v1454_v14 = vsub.f32 %v1446_v9, %v1420_v11  ;;  %2006 = vmatprep.mubr.bf16.mxu1 %v1457_v35 }
 0x65d   : > { %v1458_v19 = vpack.c.bf16 %v1454_v14, %v1453_v16 }
 0x65f   : > { %2007 = vmatmul.mubr.bf16.vlgmr.msra.gmra.mrb[32].mxu1 %v1458_v19 }
 0x726   : > { %v2004_v50 = vpop.f32.mrb[40].mxu0 }
 0x727   : > { %v1590_v54 = vmul.f32 %v2004_v50, %v2941_v1  ;;  %v1557_v10 = vpop.f32.mrb[41].mxu0 }
 0x728   : > { %v1588_v55 = vmul.f32 %v1557_v10, %v2941_v1  ;;  %v2005_v61 = vpop.f32.mrb[42].mxu0 }
 0x729   : > { %v1598_v25 = vadd.f32 %v1590_v54, %v2944_v13  ;;  %v1591_v59 = vmul.f32 %v2005_v61, %v2941_v1  ;;  %v1560_v42 = vpop.f32.mrb[43].mxu0 }
 0x72a   : > { %v1596_v62 = vadd.f32 %v1588_v55, %v2944_v13  ;;  %v1589_v3 = vmul.f32 %v1560_v42, %v2941_v1 }
 0x72b   : > { %v1606_v51 = vmax.f32 %v1598_v25, 0.0  ;;  %v1599_v18 = vadd.f32 %v1591_v59, %v2944_v13 }
 0x72c   : > { %v1604_v57 = vmax.f32 %v1596_v62, 0.0  ;;  %v1597_v48 = vadd.f32 %v1589_v3, %v2944_v13 }
 0x72d   : > { %v1614_v22 = vadd.f32 %v3025_v6, %v1606_v51  ;;  %v1607_v46 = vmax.f32 %v1599_v18, 0.0 }
 0x72e   : > { %v1612_v27 = vadd.f32 %v3022_v41, %v1604_v57  ;;  %v1605_v21 = vmax.f32 %v1597_v48, 0.0 }
 0x72f   : > { %1824 = vst [vmem:[%s2957_s8 + $0x50] sm:$0xff] %v1614_v22  ;;  %v1615_v32 = vadd.f32 %v3033_v2, %v1607_v46 }
 0x730   : > { %1822 = vst [vmem:[%s2957_s8 + $0x40] sm:$0xff] %v1612_v27  ;;  %v1613_v56 = vadd.f32 %v3028_v5, %v1605_v21 }
 0x731   : > { %1825 = vst [vmem:[%s2957_s8 + $0x58] sm:$0xff] %v1615_v32 }
 0x732   : > { %1823 = vst [vmem:[%s2957_s8 + $0x48] sm:$0xff] %v1613_v56  ;;  %v2008_v17 = vpop.f32.mrb[32].mxu1 }
 0x733   : > { %v1594_v0 = vmul.f32 %v2008_v17, %v2941_v1  ;;  %v1573_v20 = vpop.f32.mrb[33].mxu1 }
 0x734   : > { %v1592_v6 = vmul.f32 %v1573_v20, %v2941_v1  ;;  %v2009_v23 = vpop.f32.mrb[34].mxu1 }
 0x735   : > { %v1602_v41 = vadd.f32 %v1594_v0, %v2944_v13  ;;  %v1595_v26 = vmul.f32 %v2009_v23, %v2941_v1  ;;  %v1576_v2 = vpop.f32.mrb[35].mxu1 }
 0x736   : > { %v1600_v53 = vadd.f32 %v1592_v6, %v2944_v13  ;;  %v1593_v5 = vmul.f32 %v1576_v2, %v2941_v1 }
 0x737   : > { %v1610_v30 = vmax.f32 %v1602_v41, 0.0  ;;  %v1603_v31 = vadd.f32 %v1595_v26, %v2944_v13 }
 0x738   : > { %v1608_v12 = vmax.f32 %v1600_v53, 0.0  ;;  %v1601_v37 = vadd.f32 %v1593_v5, %v2944_v13 }
 0x739   : > { %v1618_v38 = vadd.f32 %v3054_v60, %v1610_v30  ;;  %v1611_v29 = vmax.f32 %v1603_v31, 0.0 }
 0x73a   : > { %v1616_v44 = vadd.f32 %v3046_v28, %v1608_v12  ;;  %v1609_v7 = vmax.f32 %v1601_v37, 0.0 }
 0x73b   : > { %1828 = vst [vmem:[%s2957_s8 + $0x70] sm:$0xff] %v1618_v38  ;;  %v1619_v1 = vadd.f32 %v1805_v45, %v1611_v29 }
 0x73c   : > { %1826 = vst [vmem:[%s2957_s8 + $0x60] sm:$0xff] %v1616_v44  ;;  %v1617_v13 = vadd.f32 %v3049_v33, %v1609_v7 }
 0x73d   : > { %1829 = vst [vmem:[%s2957_s8 + $0x78] sm:$0xff] %v1619_v1 }
 0x73e   : > { %1827 = vst [vmem:[%s2957_s8 + $0x68] sm:$0xff] %v1617_v13 }
 0x73f   : > { %2296 = shalt.err (!%p2293_p6)
}
 0x740   : > { %s2297_s9 = scalar_lea.hbm %s3098_s7, 2048  ;;  %s2301_s11 = scalar_lea.hbm %s3152_s4, 4096 }
 0x741   : > { %p2298_p8 = scmp.ne.s32.totalorder %s3098_s7, %s2297_s9  ;;  %p2302_p4 = scmp.lt.u32.totalorder %s3098_s7, %s3152_s4 }
 0x742   : > { %p2303_p11 = scmp.lt.u32.totalorder %s2301_s11, %s2297_s9  ;;  %p2305_p3 = scmp.lt.u32.totalorder %s2297_s9, %s3098_s7 }
 0x743   : > { %p2299_p10 = pnand %p2298_p8, %p2486_p12 }
 0x744   : > { %p2304_p13 = por %p2303_p11, %p2302_p4 }
 0x745   : > { %p2300_p0 = pneg %p2299_p10 }
 0x746   : > { %p2306_p7 = por %p2305_p3, %p2304_p13 }
 0x748   : > { %p2307_p9 = pnand %p2306_p7, %p2300_p0 }
 0x74a   : > { %2310 = shalt.err (!%p2307_p9)
}
 0x74b   : > { %s2368_s26 = smov 128   ;;  %s2369_s8 = smov 8  }
 0x74c   : > { %2034 = dma.vmem_to_hbm [thread:$0]  (%p2486_p12), %s3100_s29, 2048, %s3098_s7, %s1630_s19, %s2368_s26, %s2368_s26, %s2369_s8  }
 0x74d PF: > { %s1659_s12 = sand.u32 1, %s2345_s15   ;;  %p3169_p1 = scmp.ne.s32.totalorder %s3158_s22, 0 }
 0x74e   : > { %p3170_p5 = scmp.ge.s32.totalorder %s2357_s18, 2  ;;  %s1660_s10 = scalar_lea.sflag [#allocation4], %s1659_s12 }
 0x750   : > { %p2048_p2 = pnand %p3170_p5, %p3169_p1 }
 0x752   : > { %2340 = dma.done.wait (!%p2048_p2), %s1660_s10, 2048  }
 0x753   : > { %2342 = vsyncadd (!%p2048_p2), %s1660_s10, 4294965248  ;;  %p20_p6 = scmp.ge.s32.totalorder %s2451_s27, 4   ;;  %s3171_s15 = smov %s2349_s16 }
 0x754   : > { %s3172_s16 = smov %s2353_s17  ;;  %s3173_s17 = smov %s2482_s24 }
 0x755   : > { %s3174_s18 = smov %s2451_s27  ;;  %22 = sbr.rel (!%p20_p6) target bundleno = 9 (0x9), region = 101 }
 0x75c   :  { %1665 = vsyncpa [#allocation3], 1 }
 0x75d   :  { %1667 = vsyncpa [#allocation3 + $0x1], 1 }
 0x75e   :  { %1668 = vsyncpa [#allocation6], 1 }
 0x75f   :  { %1670 = vsyncpa [#allocation6 + $0x1], 1 }
 0x760   :  { %1671 = vsyncpa [#allocation4], 1 }
 0x761   :  { %1673 = vsyncpa [#allocation4 + $0x1], 1 }

</bundles_post_ra>
